<compile_context>
chip_gen: v7x
topology: tpu7x:2x2x1
jax: 0.10.0
libtpu: 0.0.40
codegen_flags: <defaults>
</compile_context>

<pallas_src>
import functools

import jax
import jax.numpy as jnp
from jax.experimental import pallas as pl
from jax.experimental.pallas import tpu as pltpu

EPS = 1e-7        # module default epsilon
_L_CENTER = 50.0  # centering constant for the L channel (stability of sum-of-squares)
_LANES = 512      # lane (last-dim) tile width


# --------------------------------------------------------------------------------------
# Color-space math on per-channel pixel planes (any shape).  Pure jnp -> usable both
# inside the Pallas kernels and in the plain-JAX reference used for the self-check.
# Powers are written as exp(k*log(.)) so they lower cleanly to the EUP.
# --------------------------------------------------------------------------------------
def _srgb_to_linear(c):
    hi = jnp.exp(2.4 * jnp.log((c + 0.055) / 1.055))   # arg > 0 for c >= 0
    return jnp.where(c > 0.04045, hi, c / 12.92)


def _linear_to_srgb(lin):
    safe = jnp.maximum(lin, 0.0031308)
    hi = 1.055 * jnp.exp(jnp.log(safe) / 2.4) - 0.055
    return jnp.where(lin > 0.0031308, hi, 12.92 * lin)


def _lab_f(t):
    t_safe = jnp.maximum(t, 0.008856)
    cube_root = jnp.exp(jnp.log(t_safe) / 3.0)
    return jnp.where(t > 0.008856, cube_root, 7.787 * t + 4.0 / 29.0)


def _lab_finv(t):
    return jnp.where(t > 0.2068966, t * t * t, (t - 4.0 / 29.0) / 7.787)


def _rgb_to_lab(r, g, b):
    """Per-channel sRGB planes in [0,1] -> CIE-Lab planes (same shape)."""
    rl = _srgb_to_linear(r)
    gl = _srgb_to_linear(g)
    bl = _srgb_to_linear(b)
    X = 0.412453 * rl + 0.357580 * gl + 0.180423 * bl
    Y = 0.212671 * rl + 0.715160 * gl + 0.072169 * bl
    Z = 0.019334 * rl + 0.119193 * gl + 0.950227 * bl
    fx = _lab_f(X / 0.95047)
    fy = _lab_f(Y)
    fz = _lab_f(Z / 1.08883)
    L = 116.0 * fy - 16.0
    a = 500.0 * (fx - fy)
    bb = 200.0 * (fy - fz)
    return L, a, bb


def _lab_to_rgb(L, a, bb):
    """CIE-Lab planes -> sRGB planes."""
    fy = (L + 16.0) / 116.0
    fx = a / 500.0 + fy
    fz = fy - bb / 200.0
    X = _lab_finv(fx) * 0.95047
    Y = _lab_finv(fy)
    Z = _lab_finv(fz) * 1.08883
    r = 3.2404813432005266 * X - 1.5371515162713185 * Y - 0.49853632616888777 * Z
    g = -0.9692549499965682 * X + 1.8759900014898907 * Y + 0.04155592655829284 * Z
    b = 0.05564664094065432 * X - 0.20404133836651123 * Y + 1.0573110696453443 * Z
    return _linear_to_srgb(r), _linear_to_srgb(g), _linear_to_srgb(b)


# --------------------------------------------------------------------------------------
# Kernel 1: fused rgb->lab (materialised) + per-(batch, channel) sum / sum-of-squares.
#   grid = (B, num_pixel_row_tiles); batch "parallel", pixel axis "arbitrary" (reduction).
#   ssum/ssq outputs are resident accumulators (same block index across the pixel axis).
# --------------------------------------------------------------------------------------
def _stats_kernel(x_ref, lab_ref, ssum_ref, ssq_ref, *,
                  n_valid, row_tile, lanes, need_mask):
    t = pl.program_id(1)

    @pl.when(t == 0)
    def _init():
        ssum_ref[...] = jnp.zeros_like(ssum_ref)
        ssq_ref[...] = jnp.zeros_like(ssq_ref)

    r = x_ref[0, 0]                      # (row_tile, lanes) dense planes
    g = x_ref[0, 1]
    b = x_ref[0, 2]
    L, a, bb = _rgb_to_lab(r, g, b)

    # Materialise LAB so pass 2 skips the rgb->lab recompute (EUP is the bottleneck).
    lab_ref[0, 0] = L
    lab_ref[0, 1] = a
    lab_ref[0, 2] = bb

    Lc = L - _L_CENTER                   # centred L for numerically stabler sum-of-squares
    if need_mask:
        row = jax.lax.broadcasted_iota(jnp.int32, (row_tile, lanes), 0)
        lane = jax.lax.broadcasted_iota(jnp.int32, (row_tile, lanes), 1)
        gidx = (t * row_tile + row) * lanes + lane
        valid = gidx < n_valid
        zero = jnp.zeros_like(L)
        Lc = jnp.where(valid, Lc, zero)
        a = jnp.where(valid, a, zero)
        bb = jnp.where(valid, bb, zero)

    ssum_ref[0, 0] += jnp.sum(Lc, keepdims=True)
    ssum_ref[0, 1] += jnp.sum(a, keepdims=True)
    ssum_ref[0, 2] += jnp.sum(bb, keepdims=True)
    ssq_ref[0, 0] += jnp.sum(Lc * Lc, keepdims=True)
    ssq_ref[0, 1] += jnp.sum(a * a, keepdims=True)
    ssq_ref[0, 2] += jnp.sum(bb * bb, keepdims=True)


# --------------------------------------------------------------------------------------
# Kernel 2: elementwise normalize tile:  lab*scale + shift  ->  lab_to_rgb
#   grid = (B, num_pixel_row_tiles); both axes "parallel" (independent tiles).
# --------------------------------------------------------------------------------------
def _norm_kernel(lab_ref, scale_ref, shift_ref, o_ref):
    L = lab_ref[0, 0] * scale_ref[0, 0] + shift_ref[0, 0]
    a = lab_ref[0, 1] * scale_ref[0, 1] + shift_ref[0, 1]
    bb = lab_ref[0, 2] * scale_ref[0, 2] + shift_ref[0, 2]
    r, g, b = _lab_to_rgb(L, a, bb)
    # Direct per-channel stores: full, unmasked lane-dense vst (no channel concat).
    o_ref[0, 0] = r
    o_ref[0, 1] = g
    o_ref[0, 2] = b
    # TODO(synk): upstream lab_to_rgb may clip sRGB to [0,1]; left unclipped to match
    # the reference forward used for the correctness check.


# --------------------------------------------------------------------------------------
# Tiling helpers.
# --------------------------------------------------------------------------------------
def _round_up(v, m):
    return ((v + m - 1) // m) * m


def _pick_row_tile(rows):
    """Rows-per-block: big (<=256 -> 1.5 MiB f32 block) but with bounded padding waste."""
    rows8 = _round_up(rows, 8)
    if rows8 <= 256:
        return rows8
    for rt in (256, 128, 64, 32, 16, 8):
        waste = _round_up(rows, rt) - rows
        if waste <= max(rows // 8, 8):
            return rt
    return 8


# --------------------------------------------------------------------------------------
# Forward wrapper.
# --------------------------------------------------------------------------------------
@jax.jit
def template_norm_forward(x, mu0, sigma0):
    """TemplateNorm.forward.  x: (B, 3, H, W) float32 in [0, 1]."""
    B, C, H, W = x.shape
    assert C == 3, "TemplateNorm expects 3-channel RGB input"
    N = H * W

    rows = -(-N // _LANES)                    # cdiv
    row_tile = _pick_row_tile(rows)
    r_pad = _round_up(rows, row_tile)
    n_pad = r_pad * _LANES
    nt = r_pad // row_tile
    need_mask = (n_pad != N)

    xf = x.reshape(B, C, N).astype(jnp.float32)
    if need_mask:
        xf = jnp.pad(xf, ((0, 0), (0, 0), (0, n_pad - N)))
    x4 = xf.reshape(B, C, r_pad, _LANES)      # channels leading; dense (row, lane) planes

    block = (1, 3, row_tile, _LANES)
    cparams_reduce = pltpu.CompilerParams(
        dimension_semantics=("parallel", "arbitrary"),
        vmem_limit_bytes=32 * 1024 * 1024)
    cparams_map = pltpu.CompilerParams(
        dimension_semantics=("parallel", "parallel"),
        vmem_limit_bytes=32 * 1024 * 1024)

    # ---- Pass 1: rgb->lab (materialised) + per-(b, c) sum / sum-of-squares ----
    lab, ssum, ssq = pl.pallas_call(
        functools.partial(_stats_kernel, n_valid=N, row_tile=row_tile,
                          lanes=_LANES, need_mask=need_mask),
        out_shape=(jax.ShapeDtypeStruct((B, 3, r_pad, _LANES), jnp.float32),
                   jax.ShapeDtypeStruct((B, 3, 1, 1), jnp.float32),
                   jax.ShapeDtypeStruct((B, 3, 1, 1), jnp.float32)),
        grid=(B, nt),
        in_specs=[pl.BlockSpec(block, lambda b, t: (b, 0, t, 0))],
        out_specs=(pl.BlockSpec(block, lambda b, t: (b, 0, t, 0)),
                   pl.BlockSpec((1, 3, 1, 1), lambda b, t: (b, 0, 0, 0)),
                   pl.BlockSpec((1, 3, 1, 1), lambda b, t: (b, 0, 0, 0))),
        compiler_params=cparams_reduce,
        cost_estimate=pl.CostEstimate(
            flops=60 * B * n_pad,
            transcendentals=12 * B * n_pad,
            bytes_accessed=2 * 3 * 4 * B * n_pad),
    )(x4)

    # ---- Tiny per-(b, c) finalize in plain JAX: mean/std -> affine (scale, shift) ----
    n = float(N)
    denom = float(max(N - 1, 1))              # unbiased std, matching torch.std default
    center = jnp.array([_L_CENTER, 0.0, 0.0], jnp.float32).reshape(1, 3)
    s1 = ssum[:, :, 0, 0]                     # (B, 3), centred sums
    s2 = ssq[:, :, 0, 0]                      # (B, 3), centred sums of squares
    mean_c = s1 / n
    mean = mean_c + center
    var = (s2 - n * mean_c * mean_c) / denom
    std = jnp.sqrt(jnp.maximum(var, 0.0)) + EPS
    scale = (sigma0.reshape(1, 3).astype(jnp.float32) / std)
    shift = (mu0.reshape(1, 3).astype(jnp.float32) - mean * scale)
    scale4 = scale.reshape(B, 3, 1, 1)
    shift4 = shift.reshape(B, 3, 1, 1)

    # ---- Pass 2: lab*scale + shift -> lab_to_rgb (fully parallel elementwise) ----
    out4 = pl.pallas_call(
        _norm_kernel,
        out_shape=jax.ShapeDtypeStruct((B, 3, r_pad, _LANES), jnp.float32),
        grid=(B, nt),
        in_specs=[pl.BlockSpec(block, lambda b, t: (b, 0, t, 0)),
                  pl.BlockSpec((1, 3, 1, 1), lambda b, t: (b, 0, 0, 0)),
                  pl.BlockSpec((1, 3, 1, 1), lambda b, t: (b, 0, 0, 0))],
        out_specs=pl.BlockSpec(block, lambda b, t: (b, 0, t, 0)),
        compiler_params=cparams_map,
        cost_estimate=pl.CostEstimate(
            flops=50 * B * n_pad,
            transcendentals=6 * B * n_pad,
            bytes_accessed=2 * 3 * 4 * B * n_pad),
    )(lab, scale4, shift4)

    x_norm = out4.reshape(B, 3, n_pad)[:, :, :N].reshape(B, C, H, W)
    # self.model is nn.Identity() -> return (model(x_norm), x_norm)
    return x_norm, x_norm


# --------------------------------------------------------------------------------------
# Plain-JAX reference of the same forward (for the correctness self-check).
# --------------------------------------------------------------------------------------
def _reference_forward(x, mu0, sigma0):
    B, C, H, W = x.shape
    xf = x.astype(jnp.float32)
    L, a, bb = _rgb_to_lab(xf[:, 0], xf[:, 1], xf[:, 2])
    lab = jnp.stack([L, a, bb], axis=1)                                  # (B, 3, H, W)
    mean = lab.mean(axis=(2, 3), keepdims=True)
    var = jnp.sum((lab - mean) ** 2, axis=(2, 3), keepdims=True) / (H * W - 1)
    std = jnp.sqrt(var) + EPS
    nl = (lab - mean) / std * sigma0.reshape(1, 3, 1, 1) + mu0.reshape(1, 3, 1, 1)
    r, g, b = _lab_to_rgb(nl[:, 0], nl[:, 1], nl[:, 2])
    return jnp.stack([r, g, b], axis=1)


if __name__ == "__main__":
    key = jax.random.PRNGKey(0)
    mu0 = jnp.array([64.0, 20.0, -10.0], jnp.float32)      # module buffer defaults
    sigma0 = jnp.array([12.0, 7.0, 5.0], jnp.float32)

    # (B, H, W): one 128-friendly shape and one odd shape that exercises the pad+mask path.
    for (B, H, W) in [(2, 16, 16), (1, 20, 13)]:
        x = jax.random.uniform(jax.random.fold_in(key, H * W),
                               (B, 3, H, W), dtype=jnp.float32)          # in [0, 1)
        assert float(jnp.max(x)) <= 1.0 and float(jnp.min(x)) >= 0.0     # module's input assert

        out, x_norm = template_norm_forward(x, mu0, sigma0)
        jax.block_until_ready(out)

        assert out.shape == (B, 3, H, W)
        assert bool(jnp.all(jnp.isfinite(out)))

        ref = _reference_forward(x, mu0, sigma0)
        max_err = float(jnp.max(jnp.abs(out - ref)))
        assert max_err < 2e-3, f"Pallas output differs from JAX reference: {max_err}"

    print("KERNEL_OK")
</pallas_src>

<mosaic_0001>
module attributes {stable_mosaic.version = 11 : i64} {
  func.func @_stats_kernel(%arg0: i32, %arg1: i32, %arg2: memref<1x3x8x512xf32, #tpu.memory_space<vmem>>, %arg3: memref<1x3x8x512xf32, #tpu.memory_space<vmem>>, %arg4: memref<1x3x1x1xf32, #tpu.memory_space<vmem>>, %arg5: memref<1x3x1x1xf32, #tpu.memory_space<vmem>>) attributes {dimension_semantics = [#tpu.dimension_semantics<parallel>, #tpu.dimension_semantics<arbitrary>], iteration_bounds = array<i64: 2, 1>, scalar_prefetch = 0 : i64, scratch_operands = 0 : i64, tpu.core_type = #tpu.core_type<tc>, window_params = [{transform_indices = @transform_0, window_bounds = array<i64: 1, 3, 8, 512>}, {transform_indices = @transform_1, window_bounds = array<i64: 1, 3, 8, 512>}, {transform_indices = @transform_2, window_bounds = array<i64: 1, 3, 1, 1>}, {transform_indices = @transform_3, window_bounds = array<i64: 1, 3, 1, 1>}]} {
    %c0_i32 = arith.constant 0 : i32
    %0 = arith.cmpi eq, %arg1, %c0_i32 : i32
    %1 = arith.extui %0 : i1 to i32
    %c0_i32_0 = arith.constant 0 : i32
    %2 = arith.cmpi ne, %1, %c0_i32_0 : i32
    scf.if %2 {
      %cst_122 = arith.constant 0.000000e+00 : f32
      %219 = vector.broadcast %cst_122 : f32 to vector<1x3x1x1xf32>
      %c0_123 = arith.constant 0 : index
      %c0_124 = arith.constant 0 : index
      %c0_125 = arith.constant 0 : index
      %c0_126 = arith.constant 0 : index
      %220 = vector.load %arg4[%c0_123, %c0_124, %c0_125, %c0_126] : memref<1x3x1x1xf32, #tpu.memory_space<vmem>>, vector<1x3x1x1xf32>
      tpu.vector_store %arg4[%c0_123, %c0_124, %c0_125, %c0_126], %219 {strides = array<i32>} : memref<1x3x1x1xf32, #tpu.memory_space<vmem>>, vector<1x3x1x1xf32>,
      %cst_127 = arith.constant 0.000000e+00 : f32
      %221 = vector.broadcast %cst_127 : f32 to vector<1x3x1x1xf32>
      %c0_128 = arith.constant 0 : index
      %c0_129 = arith.constant 0 : index
      %c0_130 = arith.constant 0 : index
      %c0_131 = arith.constant 0 : index
      %222 = vector.load %arg5[%c0_128, %c0_129, %c0_130, %c0_131] : memref<1x3x1x1xf32, #tpu.memory_space<vmem>>, vector<1x3x1x1xf32>
      tpu.vector_store %arg5[%c0_128, %c0_129, %c0_130, %c0_131], %221 {strides = array<i32>} : memref<1x3x1x1xf32, #tpu.memory_space<vmem>>, vector<1x3x1x1xf32>,
    } else {
    }
    %c0 = arith.constant 0 : index
    %c0_1 = arith.constant 0 : index
    %c0_2 = arith.constant 0 : index
    %c0_3 = arith.constant 0 : index
    %3 = vector.load %arg2[%c0, %c0_1, %c0_2, %c0_3] : memref<1x3x8x512xf32, #tpu.memory_space<vmem>>, vector<1x1x8x512xf32>
    %4 = vector.shape_cast %3 : vector<1x1x8x512xf32> to vector<8x512xf32>
    %c0_4 = arith.constant 0 : index
    %c1 = arith.constant 1 : index
    %c0_5 = arith.constant 0 : index
    %c0_6 = arith.constant 0 : index
    %5 = vector.load %arg2[%c0_4, %c1, %c0_5, %c0_6] : memref<1x3x8x512xf32, #tpu.memory_space<vmem>>, vector<1x1x8x512xf32>
    %6 = vector.shape_cast %5 : vector<1x1x8x512xf32> to vector<8x512xf32>
    %c0_7 = arith.constant 0 : index
    %c2 = arith.constant 2 : index
    %c0_8 = arith.constant 0 : index
    %c0_9 = arith.constant 0 : index
    %7 = vector.load %arg2[%c0_7, %c2, %c0_8, %c0_9] : memref<1x3x8x512xf32, #tpu.memory_space<vmem>>, vector<1x1x8x512xf32>
    %8 = vector.shape_cast %7 : vector<1x1x8x512xf32> to vector<8x512xf32>
    %cst = arith.constant 5.500000e-02 : f32
    %9 = vector.broadcast %cst : f32 to vector<8x512xf32>
    %10 = arith.addf %4, %9 : vector<8x512xf32>
    %cst_10 = arith.constant 1.055000e+00 : f32
    %11 = vector.broadcast %cst_10 : f32 to vector<8x512xf32>
    %12 = arith.divf %10, %11 : vector<8x512xf32>
    %13 = math.log %12 : vector<8x512xf32>
    %cst_11 = arith.constant 2.400000e+00 : f32
    %14 = vector.broadcast %cst_11 : f32 to vector<8x512xf32>
    %15 = arith.mulf %14, %13 : vector<8x512xf32>
    %16 = math.exp %15 : vector<8x512xf32>
    %cst_12 = arith.constant 4.045000e-02 : f32
    %17 = vector.broadcast %cst_12 : f32 to vector<8x512xf32>
    %18 = arith.cmpf ogt, %4, %17 : vector<8x512xf32>
    %cst_13 = arith.constant 1.292000e+01 : f32
    %19 = vector.broadcast %cst_13 : f32 to vector<8x512xf32>
    %20 = arith.divf %4, %19 : vector<8x512xf32>
    %21 = arith.select %18, %16, %20 : vector<8x512xi1>, vector<8x512xf32>
    %cst_14 = arith.constant 5.500000e-02 : f32
    %22 = vector.broadcast %cst_14 : f32 to vector<8x512xf32>
    %23 = arith.addf %6, %22 : vector<8x512xf32>
    %cst_15 = arith.constant 1.055000e+00 : f32
    %24 = vector.broadcast %cst_15 : f32 to vector<8x512xf32>
    %25 = arith.divf %23, %24 : vector<8x512xf32>
    %26 = math.log %25 : vector<8x512xf32>
    %cst_16 = arith.constant 2.400000e+00 : f32
    %27 = vector.broadcast %cst_16 : f32 to vector<8x512xf32>
    %28 = arith.mulf %27, %26 : vector<8x512xf32>
    %29 = math.exp %28 : vector<8x512xf32>
    %cst_17 = arith.constant 4.045000e-02 : f32
    %30 = vector.broadcast %cst_17 : f32 to vector<8x512xf32>
    %31 = arith.cmpf ogt, %6, %30 : vector<8x512xf32>
    %cst_18 = arith.constant 1.292000e+01 : f32
    %32 = vector.broadcast %cst_18 : f32 to vector<8x512xf32>
    %33 = arith.divf %6, %32 : vector<8x512xf32>
    %34 = arith.select %31, %29, %33 : vector<8x512xi1>, vector<8x512xf32>
    %cst_19 = arith.constant 5.500000e-02 : f32
    %35 = vector.broadcast %cst_19 : f32 to vector<8x512xf32>
    %36 = arith.addf %8, %35 : vector<8x512xf32>
    %cst_20 = arith.constant 1.055000e+00 : f32
    %37 = vector.broadcast %cst_20 : f32 to vector<8x512xf32>
    %38 = arith.divf %36, %37 : vector<8x512xf32>
    %39 = math.log %38 : vector<8x512xf32>
    %cst_21 = arith.constant 2.400000e+00 : f32
    %40 = vector.broadcast %cst_21 : f32 to vector<8x512xf32>
    %41 = arith.mulf %40, %39 : vector<8x512xf32>
    %42 = math.exp %41 : vector<8x512xf32>
    %cst_22 = arith.constant 4.045000e-02 : f32
    %43 = vector.broadcast %cst_22 : f32 to vector<8x512xf32>
    %44 = arith.cmpf ogt, %8, %43 : vector<8x512xf32>
    %cst_23 = arith.constant 1.292000e+01 : f32
    %45 = vector.broadcast %cst_23 : f32 to vector<8x512xf32>
    %46 = arith.divf %8, %45 : vector<8x512xf32>
    %47 = arith.select %44, %42, %46 : vector<8x512xi1>, vector<8x512xf32>
    %cst_24 = arith.constant 4.124530e-01 : f32
    %48 = vector.broadcast %cst_24 : f32 to vector<8x512xf32>
    %49 = arith.mulf %48, %21 : vector<8x512xf32>
    %cst_25 = arith.constant 3.575800e-01 : f32
    %50 = vector.broadcast %cst_25 : f32 to vector<8x512xf32>
    %51 = arith.mulf %50, %34 : vector<8x512xf32>
    %52 = arith.addf %49, %51 : vector<8x512xf32>
    %cst_26 = arith.constant 1.804230e-01 : f32
    %53 = vector.broadcast %cst_26 : f32 to vector<8x512xf32>
    %54 = arith.mulf %53, %47 : vector<8x512xf32>
    %55 = arith.addf %52, %54 : vector<8x512xf32>
    %cst_27 = arith.constant 2.126710e-01 : f32
    %56 = vector.broadcast %cst_27 : f32 to vector<8x512xf32>
    %57 = arith.mulf %56, %21 : vector<8x512xf32>
    %cst_28 = arith.constant 7.151600e-01 : f32
    %58 = vector.broadcast %cst_28 : f32 to vector<8x512xf32>
    %59 = arith.mulf %58, %34 : vector<8x512xf32>
    %60 = arith.addf %57, %59 : vector<8x512xf32>
    %cst_29 = arith.constant 7.216900e-02 : f32
    %61 = vector.broadcast %cst_29 : f32 to vector<8x512xf32>
    %62 = arith.mulf %61, %47 : vector<8x512xf32>
    %63 = arith.addf %60, %62 : vector<8x512xf32>
    %cst_30 = arith.constant 1.933400e-02 : f32
    %64 = vector.broadcast %cst_30 : f32 to vector<8x512xf32>
    %65 = arith.mulf %64, %21 : vector<8x512xf32>
    %cst_31 = arith.constant 1.191930e-01 : f32
    %66 = vector.broadcast %cst_31 : f32 to vector<8x512xf32>
    %67 = arith.mulf %66, %34 : vector<8x512xf32>
    %68 = arith.addf %65, %67 : vector<8x512xf32>
    %cst_32 = arith.constant 9.502270e-01 : f32
    %69 = vector.broadcast %cst_32 : f32 to vector<8x512xf32>
    %70 = arith.mulf %69, %47 : vector<8x512xf32>
    %71 = arith.addf %68, %70 : vector<8x512xf32>
    %cst_33 = arith.constant 0.95046997 : f32
    %72 = vector.broadcast %cst_33 : f32 to vector<8x512xf32>
    %73 = arith.divf %55, %72 : vector<8x512xf32>
    %cst_34 = arith.constant 8.856000e-03 : f32
    %74 = vector.broadcast %cst_34 : f32 to vector<8x512xf32>
    %75 = arith.maximumf %73, %74 : vector<8x512xf32>
    %76 = math.log %75 : vector<8x512xf32>
    %cst_35 = arith.constant 3.000000e+00 : f32
    %77 = vector.broadcast %cst_35 : f32 to vector<8x512xf32>
    %78 = arith.divf %76, %77 : vector<8x512xf32>
    %79 = math.exp %78 : vector<8x512xf32>
    %cst_36 = arith.constant 8.856000e-03 : f32
    %80 = vector.broadcast %cst_36 : f32 to vector<8x512xf32>
    %81 = arith.cmpf ogt, %73, %80 : vector<8x512xf32>
    %cst_37 = arith.constant 7.787000e+00 : f32
    %82 = vector.broadcast %cst_37 : f32 to vector<8x512xf32>
    %83 = arith.mulf %82, %73 : vector<8x512xf32>
    %cst_38 = arith.constant 0.137931034 : f32
    %84 = vector.broadcast %cst_38 : f32 to vector<8x512xf32>
    %85 = arith.addf %83, %84 : vector<8x512xf32>
    %86 = arith.select %81, %79, %85 : vector<8x512xi1>, vector<8x512xf32>
    %cst_39 = arith.constant 8.856000e-03 : f32
    %87 = vector.broadcast %cst_39 : f32 to vector<8x512xf32>
    %88 = arith.maximumf %63, %87 : vector<8x512xf32>
    %89 = math.log %88 : vector<8x512xf32>
    %cst_40 = arith.constant 3.000000e+00 : f32
    %90 = vector.broadcast %cst_40 : f32 to vector<8x512xf32>
    %91 = arith.divf %89, %90 : vector<8x512xf32>
    %92 = math.exp %91 : vector<8x512xf32>
    %cst_41 = arith.constant 8.856000e-03 : f32
    %93 = vector.broadcast %cst_41 : f32 to vector<8x512xf32>
    %94 = arith.cmpf ogt, %63, %93 : vector<8x512xf32>
    %cst_42 = arith.constant 7.787000e+00 : f32
    %95 = vector.broadcast %cst_42 : f32 to vector<8x512xf32>
    %96 = arith.mulf %95, %63 : vector<8x512xf32>
    %cst_43 = arith.constant 0.137931034 : f32
    %97 = vector.broadcast %cst_43 : f32 to vector<8x512xf32>
    %98 = arith.addf %96, %97 : vector<8x512xf32>
    %99 = arith.select %94, %92, %98 : vector<8x512xi1>, vector<8x512xf32>
    %cst_44 = arith.constant 1.088830e+00 : f32
    %100 = vector.broadcast %cst_44 : f32 to vector<8x512xf32>
    %101 = arith.divf %71, %100 : vector<8x512xf32>
    %cst_45 = arith.constant 8.856000e-03 : f32
    %102 = vector.broadcast %cst_45 : f32 to vector<8x512xf32>
    %103 = arith.maximumf %101, %102 : vector<8x512xf32>
    %104 = math.log %103 : vector<8x512xf32>
    %cst_46 = arith.constant 3.000000e+00 : f32
    %105 = vector.broadcast %cst_46 : f32 to vector<8x512xf32>
    %106 = arith.divf %104, %105 : vector<8x512xf32>
    %107 = math.exp %106 : vector<8x512xf32>
    %cst_47 = arith.constant 8.856000e-03 : f32
    %108 = vector.broadcast %cst_47 : f32 to vector<8x512xf32>
    %109 = arith.cmpf ogt, %101, %108 : vector<8x512xf32>
    %cst_48 = arith.constant 7.787000e+00 : f32
    %110 = vector.broadcast %cst_48 : f32 to vector<8x512xf32>
    %111 = arith.mulf %110, %101 : vector<8x512xf32>
    %cst_49 = arith.constant 0.137931034 : f32
    %112 = vector.broadcast %cst_49 : f32 to vector<8x512xf32>
    %113 = arith.addf %111, %112 : vector<8x512xf32>
    %114 = arith.select %109, %107, %113 : vector<8x512xi1>, vector<8x512xf32>
    %cst_50 = arith.constant 1.160000e+02 : f32
    %115 = vector.broadcast %cst_50 : f32 to vector<8x512xf32>
    %116 = arith.mulf %115, %99 : vector<8x512xf32>
    %cst_51 = arith.constant 1.600000e+01 : f32
    %117 = vector.broadcast %cst_51 : f32 to vector<8x512xf32>
    %118 = arith.subf %116, %117 : vector<8x512xf32>
    %119 = arith.subf %86, %99 : vector<8x512xf32>
    %cst_52 = arith.constant 5.000000e+02 : f32
    %120 = vector.broadcast %cst_52 : f32 to vector<8x512xf32>
    %121 = arith.mulf %120, %119 : vector<8x512xf32>
    %122 = arith.subf %99, %114 : vector<8x512xf32>
    %cst_53 = arith.constant 2.000000e+02 : f32
    %123 = vector.broadcast %cst_53 : f32 to vector<8x512xf32>
    %124 = arith.mulf %123, %122 : vector<8x512xf32>
    %c0_54 = arith.constant 0 : index
    %c0_55 = arith.constant 0 : index
    %c0_56 = arith.constant 0 : index
    %c0_57 = arith.constant 0 : index
    %125 = vector.load %arg3[%c0_54, %c0_55, %c0_56, %c0_57] : memref<1x3x8x512xf32, #tpu.memory_space<vmem>>, vector<1x1x8x512xf32>
    %126 = vector.shape_cast %125 : vector<1x1x8x512xf32> to vector<8x512xf32>
    %127 = vector.shape_cast %118 : vector<8x512xf32> to vector<1x1x8x512xf32>
    tpu.vector_store %arg3[%c0_54, %c0_55, %c0_56, %c0_57], %127 {strides = array<i32>} : memref<1x3x8x512xf32, #tpu.memory_space<vmem>>, vector<1x1x8x512xf32>,
    %c0_58 = arith.constant 0 : index
    %c1_59 = arith.constant 1 : index
    %c0_60 = arith.constant 0 : index
    %c0_61 = arith.constant 0 : index
    %128 = vector.load %arg3[%c0_58, %c1_59, %c0_60, %c0_61] : memref<1x3x8x512xf32, #tpu.memory_space<vmem>>, vector<1x1x8x512xf32>
    %129 = vector.shape_cast %128 : vector<1x1x8x512xf32> to vector<8x512xf32>
    %130 = vector.shape_cast %121 : vector<8x512xf32> to vector<1x1x8x512xf32>
    tpu.vector_store %arg3[%c0_58, %c1_59, %c0_60, %c0_61], %130 {strides = array<i32>} : memref<1x3x8x512xf32, #tpu.memory_space<vmem>>, vector<1x1x8x512xf32>,
    %c0_62 = arith.constant 0 : index
    %c2_63 = arith.constant 2 : index
    %c0_64 = arith.constant 0 : index
    %c0_65 = arith.constant 0 : index
    %131 = vector.load %arg3[%c0_62, %c2_63, %c0_64, %c0_65] : memref<1x3x8x512xf32, #tpu.memory_space<vmem>>, vector<1x1x8x512xf32>
    %132 = vector.shape_cast %131 : vector<1x1x8x512xf32> to vector<8x512xf32>
    %133 = vector.shape_cast %124 : vector<8x512xf32> to vector<1x1x8x512xf32>
    tpu.vector_store %arg3[%c0_62, %c2_63, %c0_64, %c0_65], %133 {strides = array<i32>} : memref<1x3x8x512xf32, #tpu.memory_space<vmem>>, vector<1x1x8x512xf32>,
    %cst_66 = arith.constant 5.000000e+01 : f32
    %134 = vector.broadcast %cst_66 : f32 to vector<8x512xf32>
    %135 = arith.subf %118, %134 : vector<8x512xf32>
    %136 = tpu.iota {dimensions = array<i32: 0>} : vector<8x512xi32>
    %137 = tpu.iota {dimensions = array<i32: 1>} : vector<8x512xi32>
    %c8_i32 = arith.constant 8 : i32
    %138 = arith.muli %arg1, %c8_i32 : i32
    %139 = vector.broadcast %138 : i32 to vector<8x512xi32>
    %140 = arith.addi %139, %136 : vector<8x512xi32>
    %c512_i32 = arith.constant 512 : i32
    %141 = vector.broadcast %c512_i32 : i32 to vector<8x512xi32>
    %142 = arith.muli %140, %141 : vector<8x512xi32>
    %143 = arith.addi %142, %137 : vector<8x512xi32>
    %c256_i32 = arith.constant 256 : i32
    %144 = vector.broadcast %c256_i32 : i32 to vector<8x512xi32>
    %145 = arith.cmpi slt, %143, %144 : vector<8x512xi32>
    %cst_67 = arith.constant 0.000000e+00 : f32
    %146 = vector.broadcast %cst_67 : f32 to vector<8x512xf32>
    %147 = arith.select %145, %135, %146 : vector<8x512xi1>, vector<8x512xf32>
    %148 = arith.select %145, %121, %146 : vector<8x512xi1>, vector<8x512xf32>
    %149 = arith.select %145, %124, %146 : vector<8x512xi1>, vector<8x512xf32>
    %c0_68 = arith.constant 0 : index
    %c0_69 = arith.constant 0 : index
    %c0_70 = arith.constant 0 : index
    %c0_71 = arith.constant 0 : index
    %150 = vector.load %arg4[%c0_68, %c0_69, %c0_70, %c0_71] : memref<1x3x1x1xf32, #tpu.memory_space<vmem>>, vector<1x1x1x1xf32>
    %151 = vector.shape_cast %150 : vector<1x1x1x1xf32> to vector<1x1xf32>
    %152 = vector.shape_cast %147 : vector<8x512xf32> to vector<1x8x512xf32>
    %cst_72 = arith.constant dense<0.000000e+00> : vector<1xf32>
    %153 = vector.multi_reduction <add>, %152, %cst_72 [1, 2] : vector<1x8x512xf32> to vector<1xf32>
    %154 = vector.shape_cast %153 : vector<1xf32> to vector<1x1x1xf32>
    %155 = vector.extract %154[0, 0, 0] : f32 from vector<1x1x1xf32>
    %156 = vector.broadcast %155 : f32 to vector<1x1xf32>
    %157 = arith.addf %151, %156 : vector<1x1xf32>
    %c0_73 = arith.constant 0 : index
    %c0_74 = arith.constant 0 : index
    %c0_75 = arith.constant 0 : index
    %c0_76 = arith.constant 0 : index
    %158 = vector.load %arg4[%c0_73, %c0_74, %c0_75, %c0_76] : memref<1x3x1x1xf32, #tpu.memory_space<vmem>>, vector<1x1x1x1xf32>
    %159 = vector.shape_cast %158 : vector<1x1x1x1xf32> to vector<1x1xf32>
    %160 = vector.shape_cast %157 : vector<1x1xf32> to vector<1x1x1x1xf32>
    tpu.vector_store %arg4[%c0_73, %c0_74, %c0_75, %c0_76], %160 {strides = array<i32>} : memref<1x3x1x1xf32, #tpu.memory_space<vmem>>, vector<1x1x1x1xf32>,
    %c0_77 = arith.constant 0 : index
    %c1_78 = arith.constant 1 : index
    %c0_79 = arith.constant 0 : index
    %c0_80 = arith.constant 0 : index
    %161 = vector.load %arg4[%c0_77, %c1_78, %c0_79, %c0_80] : memref<1x3x1x1xf32, #tpu.memory_space<vmem>>, vector<1x1x1x1xf32>
    %162 = vector.shape_cast %161 : vector<1x1x1x1xf32> to vector<1x1xf32>
    %163 = vector.shape_cast %148 : vector<8x512xf32> to vector<1x8x512xf32>
    %cst_81 = arith.constant dense<0.000000e+00> : vector<1xf32>
    %164 = vector.multi_reduction <add>, %163, %cst_81 [1, 2] : vector<1x8x512xf32> to vector<1xf32>
    %165 = vector.shape_cast %164 : vector<1xf32> to vector<1x1x1xf32>
    %166 = vector.extract %165[0, 0, 0] : f32 from vector<1x1x1xf32>
    %167 = vector.broadcast %166 : f32 to vector<1x1xf32>
    %168 = arith.addf %162, %167 : vector<1x1xf32>
    %c0_82 = arith.constant 0 : index
    %c1_83 = arith.constant 1 : index
    %c0_84 = arith.constant 0 : index
    %c0_85 = arith.constant 0 : index
    %169 = vector.load %arg4[%c0_82, %c1_83, %c0_84, %c0_85] : memref<1x3x1x1xf32, #tpu.memory_space<vmem>>, vector<1x1x1x1xf32>
    %170 = vector.shape_cast %169 : vector<1x1x1x1xf32> to vector<1x1xf32>
    %171 = vector.shape_cast %168 : vector<1x1xf32> to vector<1x1x1x1xf32>
    tpu.vector_store %arg4[%c0_82, %c1_83, %c0_84, %c0_85], %171 {strides = array<i32>} : memref<1x3x1x1xf32, #tpu.memory_space<vmem>>, vector<1x1x1x1xf32>,
    %c0_86 = arith.constant 0 : index
    %c2_87 = arith.constant 2 : index
    %c0_88 = arith.constant 0 : index
    %c0_89 = arith.constant 0 : index
    %172 = vector.load %arg4[%c0_86, %c2_87, %c0_88, %c0_89] : memref<1x3x1x1xf32, #tpu.memory_space<vmem>>, vector<1x1x1x1xf32>
    %173 = vector.shape_cast %172 : vector<1x1x1x1xf32> to vector<1x1xf32>
    %174 = vector.shape_cast %149 : vector<8x512xf32> to vector<1x8x512xf32>
    %cst_90 = arith.constant dense<0.000000e+00> : vector<1xf32>
    %175 = vector.multi_reduction <add>, %174, %cst_90 [1, 2] : vector<1x8x512xf32> to vector<1xf32>
    %176 = vector.shape_cast %175 : vector<1xf32> to vector<1x1x1xf32>
    %177 = vector.extract %176[0, 0, 0] : f32 from vector<1x1x1xf32>
    %178 = vector.broadcast %177 : f32 to vector<1x1xf32>
    %179 = arith.addf %173, %178 : vector<1x1xf32>
    %c0_91 = arith.constant 0 : index
    %c2_92 = arith.constant 2 : index
    %c0_93 = arith.constant 0 : index
    %c0_94 = arith.constant 0 : index
    %180 = vector.load %arg4[%c0_91, %c2_92, %c0_93, %c0_94] : memref<1x3x1x1xf32, #tpu.memory_space<vmem>>, vector<1x1x1x1xf32>
    %181 = vector.shape_cast %180 : vector<1x1x1x1xf32> to vector<1x1xf32>
    %182 = vector.shape_cast %179 : vector<1x1xf32> to vector<1x1x1x1xf32>
    tpu.vector_store %arg4[%c0_91, %c2_92, %c0_93, %c0_94], %182 {strides = array<i32>} : memref<1x3x1x1xf32, #tpu.memory_space<vmem>>, vector<1x1x1x1xf32>,
    %c0_95 = arith.constant 0 : index
    %c0_96 = arith.constant 0 : index
    %c0_97 = arith.constant 0 : index
    %c0_98 = arith.constant 0 : index
    %183 = vector.load %arg5[%c0_95, %c0_96, %c0_97, %c0_98] : memref<1x3x1x1xf32, #tpu.memory_space<vmem>>, vector<1x1x1x1xf32>
    %184 = vector.shape_cast %183 : vector<1x1x1x1xf32> to vector<1x1xf32>
    %185 = arith.mulf %147, %147 : vector<8x512xf32>
    %186 = vector.shape_cast %185 : vector<8x512xf32> to vector<1x8x512xf32>
    %cst_99 = arith.constant dense<0.000000e+00> : vector<1xf32>
    %187 = vector.multi_reduction <add>, %186, %cst_99 [1, 2] : vector<1x8x512xf32> to vector<1xf32>
    %188 = vector.shape_cast %187 : vector<1xf32> to vector<1x1x1xf32>
    %189 = vector.extract %188[0, 0, 0] : f32 from vector<1x1x1xf32>
    %190 = vector.broadcast %189 : f32 to vector<1x1xf32>
    %191 = arith.addf %184, %190 : vector<1x1xf32>
    %c0_100 = arith.constant 0 : index
    %c0_101 = arith.constant 0 : index
    %c0_102 = arith.constant 0 : index
    %c0_103 = arith.constant 0 : index
    %192 = vector.load %arg5[%c0_100, %c0_101, %c0_102, %c0_103] : memref<1x3x1x1xf32, #tpu.memory_space<vmem>>, vector<1x1x1x1xf32>
    %193 = vector.shape_cast %192 : vector<1x1x1x1xf32> to vector<1x1xf32>
    %194 = vector.shape_cast %191 : vector<1x1xf32> to vector<1x1x1x1xf32>
    tpu.vector_store %arg5[%c0_100, %c0_101, %c0_102, %c0_103], %194 {strides = array<i32>} : memref<1x3x1x1xf32, #tpu.memory_space<vmem>>, vector<1x1x1x1xf32>,
    %c0_104 = arith.constant 0 : index
    %c1_105 = arith.constant 1 : index
    %c0_106 = arith.constant 0 : index
    %c0_107 = arith.constant 0 : index
    %195 = vector.load %arg5[%c0_104, %c1_105, %c0_106, %c0_107] : memref<1x3x1x1xf32, #tpu.memory_space<vmem>>, vector<1x1x1x1xf32>
    %196 = vector.shape_cast %195 : vector<1x1x1x1xf32> to vector<1x1xf32>
    %197 = arith.mulf %148, %148 : vector<8x512xf32>
    %198 = vector.shape_cast %197 : vector<8x512xf32> to vector<1x8x512xf32>
    %cst_108 = arith.constant dense<0.000000e+00> : vector<1xf32>
    %199 = vector.multi_reduction <add>, %198, %cst_108 [1, 2] : vector<1x8x512xf32> to vector<1xf32>
    %200 = vector.shape_cast %199 : vector<1xf32> to vector<1x1x1xf32>
    %201 = vector.extract %200[0, 0, 0] : f32 from vector<1x1x1xf32>
    %202 = vector.broadcast %201 : f32 to vector<1x1xf32>
    %203 = arith.addf %196, %202 : vector<1x1xf32>
    %c0_109 = arith.constant 0 : index
    %c1_110 = arith.constant 1 : index
    %c0_111 = arith.constant 0 : index
    %c0_112 = arith.constant 0 : index
    %204 = vector.load %arg5[%c0_109, %c1_110, %c0_111, %c0_112] : memref<1x3x1x1xf32, #tpu.memory_space<vmem>>, vector<1x1x1x1xf32>
    %205 = vector.shape_cast %204 : vector<1x1x1x1xf32> to vector<1x1xf32>
    %206 = vector.shape_cast %203 : vector<1x1xf32> to vector<1x1x1x1xf32>
    tpu.vector_store %arg5[%c0_109, %c1_110, %c0_111, %c0_112], %206 {strides = array<i32>} : memref<1x3x1x1xf32, #tpu.memory_space<vmem>>, vector<1x1x1x1xf32>,
    %c0_113 = arith.constant 0 : index
    %c2_114 = arith.constant 2 : index
    %c0_115 = arith.constant 0 : index
    %c0_116 = arith.constant 0 : index
    %207 = vector.load %arg5[%c0_113, %c2_114, %c0_115, %c0_116] : memref<1x3x1x1xf32, #tpu.memory_space<vmem>>, vector<1x1x1x1xf32>
    %208 = vector.shape_cast %207 : vector<1x1x1x1xf32> to vector<1x1xf32>
    %209 = arith.mulf %149, %149 : vector<8x512xf32>
    %210 = vector.shape_cast %209 : vector<8x512xf32> to vector<1x8x512xf32>
    %cst_117 = arith.constant dense<0.000000e+00> : vector<1xf32>
    %211 = vector.multi_reduction <add>, %210, %cst_117 [1, 2] : vector<1x8x512xf32> to vector<1xf32>
    %212 = vector.shape_cast %211 : vector<1xf32> to vector<1x1x1xf32>
    %213 = vector.extract %212[0, 0, 0] : f32 from vector<1x1x1xf32>
    %214 = vector.broadcast %213 : f32 to vector<1x1xf32>
    %215 = arith.addf %208, %214 : vector<1x1xf32>
    %c0_118 = arith.constant 0 : index
    %c2_119 = arith.constant 2 : index
    %c0_120 = arith.constant 0 : index
    %c0_121 = arith.constant 0 : index
    %216 = vector.load %arg5[%c0_118, %c2_119, %c0_120, %c0_121] : memref<1x3x1x1xf32, #tpu.memory_space<vmem>>, vector<1x1x1x1xf32>
    %217 = vector.shape_cast %216 : vector<1x1x1x1xf32> to vector<1x1xf32>
    %218 = vector.shape_cast %215 : vector<1x1xf32> to vector<1x1x1x1xf32>
    tpu.vector_store %arg5[%c0_118, %c2_119, %c0_120, %c0_121], %218 {strides = array<i32>} : memref<1x3x1x1xf32, #tpu.memory_space<vmem>>, vector<1x1x1x1xf32>,
    return
  }
  func.func @transform_0(%arg0: i32, %arg1: i32) -> (i32, i32, i32, i32) {
    %c0_i32 = arith.constant 0 : i32
    %c0_i32_0 = arith.constant 0 : i32
    %c0_i32_1 = arith.constant 0 : i32
    return %arg0, %c0_i32, %arg1, %c0_i32_0 : i32, i32, i32, i32
  }
  func.func @transform_1(%arg0: i32, %arg1: i32) -> (i32, i32, i32, i32) {
    %c0_i32 = arith.constant 0 : i32
    %c0_i32_0 = arith.constant 0 : i32
    %c0_i32_1 = arith.constant 0 : i32
    return %arg0, %c0_i32, %arg1, %c0_i32_0 : i32, i32, i32, i32
  }
  func.func @transform_2(%arg0: i32, %arg1: i32) -> (i32, i32, i32, i32) {
    %c0_i32 = arith.constant 0 : i32
    %c0_i32_0 = arith.constant 0 : i32
    %c0_i32_1 = arith.constant 0 : i32
    %c0_i32_2 = arith.constant 0 : i32
    return %arg0, %c0_i32, %c0_i32_0, %c0_i32_1 : i32, i32, i32, i32
  }
  func.func @transform_3(%arg0: i32, %arg1: i32) -> (i32, i32, i32, i32) {
    %c0_i32 = arith.constant 0 : i32
    %c0_i32_0 = arith.constant 0 : i32
    %c0_i32_1 = arith.constant 0 : i32
    %c0_i32_2 = arith.constant 0 : i32
    return %arg0, %c0_i32, %c0_i32_0, %c0_i32_1 : i32, i32, i32, i32
  }
}

module attributes {stable_mosaic.version = 11 : i64} {
  func.func @_norm_kernel(%arg0: i32, %arg1: i32, %arg2: memref<1x3x8x512xf32, #tpu.memory_space<vmem>>, %arg3: memref<1x3x1x1xf32, #tpu.memory_space<vmem>>, %arg4: memref<1x3x1x1xf32, #tpu.memory_space<vmem>>, %arg5: memref<1x3x8x512xf32, #tpu.memory_space<vmem>>) attributes {dimension_semantics = [#tpu.dimension_semantics<parallel>, #tpu.dimension_semantics<parallel>], iteration_bounds = array<i64: 2, 1>, scalar_prefetch = 0 : i64, scratch_operands = 0 : i64, tpu.core_type = #tpu.core_type<tc>, window_params = [{transform_indices = @transform_0, window_bounds = array<i64: 1, 3, 8, 512>}, {transform_indices = @transform_1, window_bounds = array<i64: 1, 3, 1, 1>}, {transform_indices = @transform_2, window_bounds = array<i64: 1, 3, 1, 1>}, {transform_indices = @transform_3, window_bounds = array<i64: 1, 3, 8, 512>}]} {
    %c0 = arith.constant 0 : index
    %c0_0 = arith.constant 0 : index
    %c0_1 = arith.constant 0 : index
    %c0_2 = arith.constant 0 : index
    %0 = vector.load %arg2[%c0, %c0_0, %c0_1, %c0_2] : memref<1x3x8x512xf32, #tpu.memory_space<vmem>>, vector<1x1x8x512xf32>
    %1 = vector.shape_cast %0 : vector<1x1x8x512xf32> to vector<8x512xf32>
    %c0_3 = arith.constant 0 : index
    %c0_4 = arith.constant 0 : index
    %c0_5 = arith.constant 0 : index
    %c0_6 = arith.constant 0 : index
    %2 = vector.load %arg3[%c0_3, %c0_4, %c0_5, %c0_6] : memref<1x3x1x1xf32, #tpu.memory_space<vmem>>, vector<1x1x1x1xf32>
    %3 = vector.shape_cast %2 : vector<1x1x1x1xf32> to vector<1x1xf32>
    %4 = vector.broadcast %3 : vector<1x1xf32> to vector<8x512xf32>
    %5 = arith.mulf %1, %4 : vector<8x512xf32>
    %c0_7 = arith.constant 0 : index
    %c0_8 = arith.constant 0 : index
    %c0_9 = arith.constant 0 : index
    %c0_10 = arith.constant 0 : index
    %6 = vector.load %arg4[%c0_7, %c0_8, %c0_9, %c0_10] : memref<1x3x1x1xf32, #tpu.memory_space<vmem>>, vector<1x1x1x1xf32>
    %7 = vector.shape_cast %6 : vector<1x1x1x1xf32> to vector<1x1xf32>
    %8 = vector.broadcast %7 : vector<1x1xf32> to vector<8x512xf32>
    %9 = arith.addf %5, %8 : vector<8x512xf32>
    %c0_11 = arith.constant 0 : index
    %c1 = arith.constant 1 : index
    %c0_12 = arith.constant 0 : index
    %c0_13 = arith.constant 0 : index
    %10 = vector.load %arg2[%c0_11, %c1, %c0_12, %c0_13] : memref<1x3x8x512xf32, #tpu.memory_space<vmem>>, vector<1x1x8x512xf32>
    %11 = vector.shape_cast %10 : vector<1x1x8x512xf32> to vector<8x512xf32>
    %c0_14 = arith.constant 0 : index
    %c1_15 = arith.constant 1 : index
    %c0_16 = arith.constant 0 : index
    %c0_17 = arith.constant 0 : index
    %12 = vector.load %arg3[%c0_14, %c1_15, %c0_16, %c0_17] : memref<1x3x1x1xf32, #tpu.memory_space<vmem>>, vector<1x1x1x1xf32>
    %13 = vector.shape_cast %12 : vector<1x1x1x1xf32> to vector<1x1xf32>
    %14 = vector.broadcast %13 : vector<1x1xf32> to vector<8x512xf32>
    %15 = arith.mulf %11, %14 : vector<8x512xf32>
    %c0_18 = arith.constant 0 : index
    %c1_19 = arith.constant 1 : index
    %c0_20 = arith.constant 0 : index
    %c0_21 = arith.constant 0 : index
    %16 = vector.load %arg4[%c0_18, %c1_19, %c0_20, %c0_21] : memref<1x3x1x1xf32, #tpu.memory_space<vmem>>, vector<1x1x1x1xf32>
    %17 = vector.shape_cast %16 : vector<1x1x1x1xf32> to vector<1x1xf32>
    %18 = vector.broadcast %17 : vector<1x1xf32> to vector<8x512xf32>
    %19 = arith.addf %15, %18 : vector<8x512xf32>
    %c0_22 = arith.constant 0 : index
    %c2 = arith.constant 2 : index
    %c0_23 = arith.constant 0 : index
    %c0_24 = arith.constant 0 : index
    %20 = vector.load %arg2[%c0_22, %c2, %c0_23, %c0_24] : memref<1x3x8x512xf32, #tpu.memory_space<vmem>>, vector<1x1x8x512xf32>
    %21 = vector.shape_cast %20 : vector<1x1x8x512xf32> to vector<8x512xf32>
    %c0_25 = arith.constant 0 : index
    %c2_26 = arith.constant 2 : index
    %c0_27 = arith.constant 0 : index
    %c0_28 = arith.constant 0 : index
    %22 = vector.load %arg3[%c0_25, %c2_26, %c0_27, %c0_28] : memref<1x3x1x1xf32, #tpu.memory_space<vmem>>, vector<1x1x1x1xf32>
    %23 = vector.shape_cast %22 : vector<1x1x1x1xf32> to vector<1x1xf32>
    %24 = vector.broadcast %23 : vector<1x1xf32> to vector<8x512xf32>
    %25 = arith.mulf %21, %24 : vector<8x512xf32>
    %c0_29 = arith.constant 0 : index
    %c2_30 = arith.constant 2 : index
    %c0_31 = arith.constant 0 : index
    %c0_32 = arith.constant 0 : index
    %26 = vector.load %arg4[%c0_29, %c2_30, %c0_31, %c0_32] : memref<1x3x1x1xf32, #tpu.memory_space<vmem>>, vector<1x1x1x1xf32>
    %27 = vector.shape_cast %26 : vector<1x1x1x1xf32> to vector<1x1xf32>
    %28 = vector.broadcast %27 : vector<1x1xf32> to vector<8x512xf32>
    %29 = arith.addf %25, %28 : vector<8x512xf32>
    %cst = arith.constant 1.600000e+01 : f32
    %30 = vector.broadcast %cst : f32 to vector<8x512xf32>
    %31 = arith.addf %9, %30 : vector<8x512xf32>
    %cst_33 = arith.constant 1.160000e+02 : f32
    %32 = vector.broadcast %cst_33 : f32 to vector<8x512xf32>
    %33 = arith.divf %31, %32 : vector<8x512xf32>
    %cst_34 = arith.constant 5.000000e+02 : f32
    %34 = vector.broadcast %cst_34 : f32 to vector<8x512xf32>
    %35 = arith.divf %19, %34 : vector<8x512xf32>
    %36 = arith.addf %35, %33 : vector<8x512xf32>
    %cst_35 = arith.constant 2.000000e+02 : f32
    %37 = vector.broadcast %cst_35 : f32 to vector<8x512xf32>
    %38 = arith.divf %29, %37 : vector<8x512xf32>
    %39 = arith.subf %33, %38 : vector<8x512xf32>
    %cst_36 = arith.constant 0.206896603 : f32
    %40 = vector.broadcast %cst_36 : f32 to vector<8x512xf32>
    %41 = arith.cmpf ogt, %36, %40 : vector<8x512xf32>
    %42 = arith.mulf %36, %36 : vector<8x512xf32>
    %43 = arith.mulf %42, %36 : vector<8x512xf32>
    %cst_37 = arith.constant 0.137931034 : f32
    %44 = vector.broadcast %cst_37 : f32 to vector<8x512xf32>
    %45 = arith.subf %36, %44 : vector<8x512xf32>
    %cst_38 = arith.constant 7.787000e+00 : f32
    %46 = vector.broadcast %cst_38 : f32 to vector<8x512xf32>
    %47 = arith.divf %45, %46 : vector<8x512xf32>
    %48 = arith.select %41, %43, %47 : vector<8x512xi1>, vector<8x512xf32>
    %cst_39 = arith.constant 0.95046997 : f32
    %49 = vector.broadcast %cst_39 : f32 to vector<8x512xf32>
    %50 = arith.mulf %48, %49 : vector<8x512xf32>
    %cst_40 = arith.constant 0.206896603 : f32
    %51 = vector.broadcast %cst_40 : f32 to vector<8x512xf32>
    %52 = arith.cmpf ogt, %33, %51 : vector<8x512xf32>
    %53 = arith.mulf %33, %33 : vector<8x512xf32>
    %54 = arith.mulf %53, %33 : vector<8x512xf32>
    %cst_41 = arith.constant 0.137931034 : f32
    %55 = vector.broadcast %cst_41 : f32 to vector<8x512xf32>
    %56 = arith.subf %33, %55 : vector<8x512xf32>
    %cst_42 = arith.constant 7.787000e+00 : f32
    %57 = vector.broadcast %cst_42 : f32 to vector<8x512xf32>
    %58 = arith.divf %56, %57 : vector<8x512xf32>
    %59 = arith.select %52, %54, %58 : vector<8x512xi1>, vector<8x512xf32>
    %cst_43 = arith.constant 0.206896603 : f32
    %60 = vector.broadcast %cst_43 : f32 to vector<8x512xf32>
    %61 = arith.cmpf ogt, %39, %60 : vector<8x512xf32>
    %62 = arith.mulf %39, %39 : vector<8x512xf32>
    %63 = arith.mulf %62, %39 : vector<8x512xf32>
    %cst_44 = arith.constant 0.137931034 : f32
    %64 = vector.broadcast %cst_44 : f32 to vector<8x512xf32>
    %65 = arith.subf %39, %64 : vector<8x512xf32>
    %cst_45 = arith.constant 7.787000e+00 : f32
    %66 = vector.broadcast %cst_45 : f32 to vector<8x512xf32>
    %67 = arith.divf %65, %66 : vector<8x512xf32>
    %68 = arith.select %61, %63, %67 : vector<8x512xi1>, vector<8x512xf32>
    %cst_46 = arith.constant 1.088830e+00 : f32
    %69 = vector.broadcast %cst_46 : f32 to vector<8x512xf32>
    %70 = arith.mulf %68, %69 : vector<8x512xf32>
    %cst_47 = arith.constant 3.24048138 : f32
    %71 = vector.broadcast %cst_47 : f32 to vector<8x512xf32>
    %72 = arith.mulf %71, %50 : vector<8x512xf32>
    %cst_48 = arith.constant 1.53715158 : f32
    %73 = vector.broadcast %cst_48 : f32 to vector<8x512xf32>
    %74 = arith.mulf %73, %59 : vector<8x512xf32>
    %75 = arith.subf %72, %74 : vector<8x512xf32>
    %cst_49 = arith.constant 0.498536319 : f32
    %76 = vector.broadcast %cst_49 : f32 to vector<8x512xf32>
    %77 = arith.mulf %76, %70 : vector<8x512xf32>
    %78 = arith.subf %75, %77 : vector<8x512xf32>
    %cst_50 = arith.constant -0.96925497 : f32
    %79 = vector.broadcast %cst_50 : f32 to vector<8x512xf32>
    %80 = arith.mulf %79, %50 : vector<8x512xf32>
    %cst_51 = arith.constant 1.875990e+00 : f32
    %81 = vector.broadcast %cst_51 : f32 to vector<8x512xf32>
    %82 = arith.mulf %81, %59 : vector<8x512xf32>
    %83 = arith.addf %80, %82 : vector<8x512xf32>
    %cst_52 = arith.constant 0.0415559262 : f32
    %84 = vector.broadcast %cst_52 : f32 to vector<8x512xf32>
    %85 = arith.mulf %84, %70 : vector<8x512xf32>
    %86 = arith.addf %83, %85 : vector<8x512xf32>
    %cst_53 = arith.constant 0.0556466393 : f32
    %87 = vector.broadcast %cst_53 : f32 to vector<8x512xf32>
    %88 = arith.mulf %87, %50 : vector<8x512xf32>
    %cst_54 = arith.constant 0.204041332 : f32
    %89 = vector.broadcast %cst_54 : f32 to vector<8x512xf32>
    %90 = arith.mulf %89, %59 : vector<8x512xf32>
    %91 = arith.subf %88, %90 : vector<8x512xf32>
    %cst_55 = arith.constant 1.05731106 : f32
    %92 = vector.broadcast %cst_55 : f32 to vector<8x512xf32>
    %93 = arith.mulf %92, %70 : vector<8x512xf32>
    %94 = arith.addf %91, %93 : vector<8x512xf32>
    %cst_56 = arith.constant 3.130800e-03 : f32
    %95 = vector.broadcast %cst_56 : f32 to vector<8x512xf32>
    %96 = arith.maximumf %78, %95 : vector<8x512xf32>
    %97 = math.log %96 : vector<8x512xf32>
    %cst_57 = arith.constant 2.400000e+00 : f32
    %98 = vector.broadcast %cst_57 : f32 to vector<8x512xf32>
    %99 = arith.divf %97, %98 : vector<8x512xf32>
    %100 = math.exp %99 : vector<8x512xf32>
    %cst_58 = arith.constant 1.055000e+00 : f32
    %101 = vector.broadcast %cst_58 : f32 to vector<8x512xf32>
    %102 = arith.mulf %101, %100 : vector<8x512xf32>
    %cst_59 = arith.constant 5.500000e-02 : f32
    %103 = vector.broadcast %cst_59 : f32 to vector<8x512xf32>
    %104 = arith.subf %102, %103 : vector<8x512xf32>
    %cst_60 = arith.constant 3.130800e-03 : f32
    %105 = vector.broadcast %cst_60 : f32 to vector<8x512xf32>
    %106 = arith.cmpf ogt, %78, %105 : vector<8x512xf32>
    %cst_61 = arith.constant 1.292000e+01 : f32
    %107 = vector.broadcast %cst_61 : f32 to vector<8x512xf32>
    %108 = arith.mulf %107, %78 : vector<8x512xf32>
    %109 = arith.select %106, %104, %108 : vector<8x512xi1>, vector<8x512xf32>
    %cst_62 = arith.constant 3.130800e-03 : f32
    %110 = vector.broadcast %cst_62 : f32 to vector<8x512xf32>
    %111 = arith.maximumf %86, %110 : vector<8x512xf32>
    %112 = math.log %111 : vector<8x512xf32>
    %cst_63 = arith.constant 2.400000e+00 : f32
    %113 = vector.broadcast %cst_63 : f32 to vector<8x512xf32>
    %114 = arith.divf %112, %113 : vector<8x512xf32>
    %115 = math.exp %114 : vector<8x512xf32>
    %cst_64 = arith.constant 1.055000e+00 : f32
    %116 = vector.broadcast %cst_64 : f32 to vector<8x512xf32>
    %117 = arith.mulf %116, %115 : vector<8x512xf32>
    %cst_65 = arith.constant 5.500000e-02 : f32
    %118 = vector.broadcast %cst_65 : f32 to vector<8x512xf32>
    %119 = arith.subf %117, %118 : vector<8x512xf32>
    %cst_66 = arith.constant 3.130800e-03 : f32
    %120 = vector.broadcast %cst_66 : f32 to vector<8x512xf32>
    %121 = arith.cmpf ogt, %86, %120 : vector<8x512xf32>
    %cst_67 = arith.constant 1.292000e+01 : f32
    %122 = vector.broadcast %cst_67 : f32 to vector<8x512xf32>
    %123 = arith.mulf %122, %86 : vector<8x512xf32>
    %124 = arith.select %121, %119, %123 : vector<8x512xi1>, vector<8x512xf32>
    %cst_68 = arith.constant 3.130800e-03 : f32
    %125 = vector.broadcast %cst_68 : f32 to vector<8x512xf32>
    %126 = arith.maximumf %94, %125 : vector<8x512xf32>
    %127 = math.log %126 : vector<8x512xf32>
    %cst_69 = arith.constant 2.400000e+00 : f32
    %128 = vector.broadcast %cst_69 : f32 to vector<8x512xf32>
    %129 = arith.divf %127, %128 : vector<8x512xf32>
    %130 = math.exp %129 : vector<8x512xf32>
    %cst_70 = arith.constant 1.055000e+00 : f32
    %131 = vector.broadcast %cst_70 : f32 to vector<8x512xf32>
    %132 = arith.mulf %131, %130 : vector<8x512xf32>
    %cst_71 = arith.constant 5.500000e-02 : f32
    %133 = vector.broadcast %cst_71 : f32 to vector<8x512xf32>
    %134 = arith.subf %132, %133 : vector<8x512xf32>
    %cst_72 = arith.constant 3.130800e-03 : f32
    %135 = vector.broadcast %cst_72 : f32 to vector<8x512xf32>
    %136 = arith.cmpf ogt, %94, %135 : vector<8x512xf32>
    %cst_73 = arith.constant 1.292000e+01 : f32
    %137 = vector.broadcast %cst_73 : f32 to vector<8x512xf32>
    %138 = arith.mulf %137, %94 : vector<8x512xf32>
    %139 = arith.select %136, %134, %138 : vector<8x512xi1>, vector<8x512xf32>
    %c0_74 = arith.constant 0 : index
    %c0_75 = arith.constant 0 : index
    %c0_76 = arith.constant 0 : index
    %c0_77 = arith.constant 0 : index
    %140 = vector.load %arg5[%c0_74, %c0_75, %c0_76, %c0_77] : memref<1x3x8x512xf32, #tpu.memory_space<vmem>>, vector<1x1x8x512xf32>
    %141 = vector.shape_cast %140 : vector<1x1x8x512xf32> to vector<8x512xf32>
    %142 = vector.shape_cast %109 : vector<8x512xf32> to vector<1x1x8x512xf32>
    tpu.vector_store %arg5[%c0_74, %c0_75, %c0_76, %c0_77], %142 {strides = array<i32>} : memref<1x3x8x512xf32, #tpu.memory_space<vmem>>, vector<1x1x8x512xf32>,
    %c0_78 = arith.constant 0 : index
    %c1_79 = arith.constant 1 : index
    %c0_80 = arith.constant 0 : index
    %c0_81 = arith.constant 0 : index
    %143 = vector.load %arg5[%c0_78, %c1_79, %c0_80, %c0_81] : memref<1x3x8x512xf32, #tpu.memory_space<vmem>>, vector<1x1x8x512xf32>
    %144 = vector.shape_cast %143 : vector<1x1x8x512xf32> to vector<8x512xf32>
    %145 = vector.shape_cast %124 : vector<8x512xf32> to vector<1x1x8x512xf32>
    tpu.vector_store %arg5[%c0_78, %c1_79, %c0_80, %c0_81], %145 {strides = array<i32>} : memref<1x3x8x512xf32, #tpu.memory_space<vmem>>, vector<1x1x8x512xf32>,
    %c0_82 = arith.constant 0 : index
    %c2_83 = arith.constant 2 : index
    %c0_84 = arith.constant 0 : index
    %c0_85 = arith.constant 0 : index
    %146 = vector.load %arg5[%c0_82, %c2_83, %c0_84, %c0_85] : memref<1x3x8x512xf32, #tpu.memory_space<vmem>>, vector<1x1x8x512xf32>
    %147 = vector.shape_cast %146 : vector<1x1x8x512xf32> to vector<8x512xf32>
    %148 = vector.shape_cast %139 : vector<8x512xf32> to vector<1x1x8x512xf32>
    tpu.vector_store %arg5[%c0_82, %c2_83, %c0_84, %c0_85], %148 {strides = array<i32>} : memref<1x3x8x512xf32, #tpu.memory_space<vmem>>, vector<1x1x8x512xf32>,
    return
  }
  func.func @transform_0(%arg0: i32, %arg1: i32) -> (i32, i32, i32, i32) {
    %c0_i32 = arith.constant 0 : i32
    %c0_i32_0 = arith.constant 0 : i32
    %c0_i32_1 = arith.constant 0 : i32
    return %arg0, %c0_i32, %arg1, %c0_i32_0 : i32, i32, i32, i32
  }
  func.func @transform_1(%arg0: i32, %arg1: i32) -> (i32, i32, i32, i32) {
    %c0_i32 = arith.constant 0 : i32
    %c0_i32_0 = arith.constant 0 : i32
    %c0_i32_1 = arith.constant 0 : i32
    %c0_i32_2 = arith.constant 0 : i32
    return %arg0, %c0_i32, %c0_i32_0, %c0_i32_1 : i32, i32, i32, i32
  }
  func.func @transform_2(%arg0: i32, %arg1: i32) -> (i32, i32, i32, i32) {
    %c0_i32 = arith.constant 0 : i32
    %c0_i32_0 = arith.constant 0 : i32
    %c0_i32_1 = arith.constant 0 : i32
    %c0_i32_2 = arith.constant 0 : i32
    return %arg0, %c0_i32, %c0_i32_0, %c0_i32_1 : i32, i32, i32, i32
  }
  func.func @transform_3(%arg0: i32, %arg1: i32) -> (i32, i32, i32, i32) {
    %c0_i32 = arith.constant 0 : i32
    %c0_i32_0 = arith.constant 0 : i32
    %c0_i32_1 = arith.constant 0 : i32
    return %arg0, %c0_i32, %arg1, %c0_i32_0 : i32, i32, i32, i32
  }
}

</mosaic_0001>

<bundles_post_ra>
// kernel: template_norm_forward.2
= control target key start
LH: loop header
LB: loop body
LE: loop exit
PB: predicated region body
PF: predicated region fallthrough
CT: control target
= control target key end

     0   :  { %s1127_s12 = smov 0   ;;  %s1129_s13 = smov 0   ;;  %s1504_s0 = inlined_call_operand.vmem [shape: f32[2,3,8,512], index: 0, kind: input, shape index: {}]   ;;  %s1505_s1 = inlined_call_operand.vmem [shape: f32[2,3,8,512], index: 1, kind: output, shape index: {0}]   ;;  %s1506_s2 = inlined_call_operand.vmem [shape: f32[2,3,1,1], index: 2, kind: output, shape index: {1}]   ;;  %s1507_s3 = inlined_call_operand.vmem [shape: f32[2,3,1,1], index: 3, kind: output, shape index: {2}]  }
   0x1   :  { %s1131_s14 = smov 0  }
   0x2 LB: > { %s26_s15 = sadd.s32 1, %s1100_s13  ;;  %p910_p0 = scmp.ge.s32.totalorder %s1104_s14, 1  ;;  %s1104_s14 = sphi %s1131_s14, %s14_s14   ;;  %s1100_s13 = sphi %s1129_s13, %s1509_s13   ;;  %s1096_s12 = sphi %s1127_s12, %s1508_s12  }
   0x3   : > { %p28_p1 = scmp.ge.s32.totalorder %s26_s15, 2  ;;  %p162_p2 = scmp.lt.s32.totalorder %s1104_s14, 3 }
   0x5   : > { %s1511_s15 = smov (%p28_p1, %s26_s15), 0  ;;  %p163_p3 = pnand %p910_p0, %p162_p2 }
   0x6   : > { %p202_p4 = scmp.lt.s32.totalorder (!%p163_p3), %s1096_s12, 1 }
   0x7   : > { %166 = sbr.rel (%p163_p3) target bundleno = 350 (0x15e), region = 24 }
   0xe   : > { %s1513_s12 = smov (!%p202_p4, %s1096_s12), 1 }
   0xf   : > { %s947_s16 = smul.u32 96, %s1513_s12 }
  0x10   : > { %s948_s23 = smul.u32 3, %s1513_s12 }
  0x11   : > { %s210_s19 = scalar_lea.vmem %s1504_s0, %s947_s16  ;;  %s1381_s22 = scalar_lea.vmem %s1505_s1, %s947_s16 }
  0x12   : > { %v1153_v0 = vld [vmem:[%s210_s19] sm:$0xff]  ;;  %v1155_v1 = vld [vmem:[%s210_s19 + $0x8] sm:$0xff]  ;;  %v1157_v2 = vld [vmem:[%s210_s19 + $0x10] sm:$0xff]  ;;  %s1458_s26 = scalar_lea.vmem %s1506_s2, %s948_s23  ;;  %s1469_s29 = scalar_lea.vmem %s1507_s3, %s948_s23 }
  0x13   : > { %v1159_v3 = vld [vmem:[%s210_s19 + $0x18] sm:$0xff]  ;;  %v253_v4 = vadd.f32 0.055, %v1153_v0  ;;  %v254_v5 = vadd.f32 0.055, %v1155_v1  ;;  %v1165_v10 = vld [vmem:[%s210_s19 + $0x20] sm:$0xff] }
  0x14   : > { %v255_v6 = vadd.f32 0.055, %v1157_v2  ;;  %v256_v7 = vadd.f32 0.055, %v1159_v3  ;;  %v1167_v11 = vld [vmem:[%s210_s19 + $0x28] sm:$0xff]  ;;  %v1169_v13 = vld [vmem:[%s210_s19 + $0x30] sm:$0xff] }
  0x15   : > { %v258_v8 = vmul.f32 0.94786733, %v253_v4  ;;  %v259_v9 = vmul.f32 0.94786733, %v254_v5  ;;  %v1171_v14 = vld [vmem:[%s210_s19 + $0x38] sm:$0xff]  ;;  %v1177_v20 = vld [vmem:[%s210_s19 + $0x40] sm:$0xff] }
  0x16   : > { %v260_v12 = vmul.f32 0.94786733, %v255_v6  ;;  %v261_v15 = vmul.f32 0.94786733, %v256_v7  ;;  %v295_v16 = vadd.f32 0.055, %v1165_v10 }
  0x17   : > { %986 = vlog2.f32 %v258_v8  ;;  %v296_v17 = vadd.f32 0.055, %v1167_v11  ;;  %v297_v18 = vadd.f32 0.055, %v1169_v13  ;;  %v298_v19 = vadd.f32 0.055, %v1171_v14 }
  0x18   : > { %988 = vlog2.f32 %v259_v9  ;;  %v1179_v21 = vld [vmem:[%s210_s19 + $0x48] sm:$0xff]  ;;  %v299_v22 = vmul.f32 0.94786733, %v295_v16  ;;  %v1181_v24 = vld [vmem:[%s210_s19 + $0x50] sm:$0xff]  ;;  %v1183_v25 = vld [vmem:[%s210_s19 + $0x58] sm:$0xff] }
  0x19   : > { %990 = vlog2.f32 %v260_v12  ;;  %v300_v23 = vmul.f32 0.94786733, %v296_v17  ;;  %v301_v26 = vmul.f32 0.94786733, %v297_v18  ;;  %v302_v27 = vmul.f32 0.94786733, %v298_v19 }
  0x1a   : > { %992 = vlog2.f32 %v261_v15  ;;  %v335_v28 = vadd.f32 0.055, %v1177_v20  ;;  %v336_v29 = vadd.f32 0.055, %v1179_v21  ;;  %v337_v30 = vadd.f32 0.055, %v1181_v24 }
  0x1b   : > { %994 = vlog2.f32 %v299_v22  ;;  %v338_v31 = vadd.f32 0.055, %v1183_v25  ;;  %v287_v56 = vmul.f32 0.07739938, %v1153_v0  ;;  %vm282_vm0 = vcmp.gt.f32.partialorder %v1153_v0, 0.04045 }
  0x1c   : > { %996 = vlog2.f32 %v300_v23  ;;  %v339_v32 = vmul.f32 0.94786733, %v335_v28  ;;  %v340_v34 = vmul.f32 0.94786733, %v336_v29  ;;  %v341_v35 = vmul.f32 0.94786733, %v337_v30 }
  0x1d   : > { %998 = vlog2.f32 %v301_v26  ;;  %v342_v36 = vmul.f32 0.94786733, %v338_v31  ;;  %vm283_vm1 = vcmp.gt.f32.partialorder %v1155_v1, 0.04045  ;;  %v288_v59 = vmul.f32 0.07739938, %v1155_v1 }
  0x1e   : > { %1000 = vlog2.f32 %v302_v27  ;;  %vm284_vm2 = vcmp.gt.f32.partialorder %v1157_v2, 0.04045  ;;  %v289_v62 = vmul.f32 0.07739938, %v1157_v2  ;;  %vm285_vm3 = vcmp.gt.f32.partialorder %v1159_v3, 0.04045 }
  0x1f   : > { %1002 = vlog2.f32 %v339_v32  ;;  %v290_v6 = vmul.f32 0.07739938, %v1159_v3  ;;  %vm323_vm4 = vcmp.gt.f32.partialorder %v1165_v10, 0.04045  ;;  %vm324_vm5 = vcmp.gt.f32.partialorder %v1167_v11, 0.04045 }
  0x20   : > { %1004 = vlog2.f32 %v340_v34  ;;  %vm325_vm6 = vcmp.gt.f32.partialorder %v1169_v13, 0.04045  ;;  %vm326_vm7 = vcmp.gt.f32.partialorder %v1171_v14, 0.04045  ;;  %vm363_vm8 = vcmp.gt.f32.partialorder %v1177_v20, 0.04045 }
  0x21   : > { %v987_v33 = vpop.eup %986  ;;  %1006 = vlog2.f32 %v341_v35  ;;  %vm364_vm9 = vcmp.gt.f32.partialorder %v1179_v21, 0.04045  ;;  %vm365_vm10 = vcmp.gt.f32.partialorder %v1181_v24, 0.04045  ;;  %vm366_vm11 = vcmp.gt.f32.partialorder %v1183_v25, 0.04045 }
  0x22   : > { %v989_v37 = vpop.eup %988  ;;  %v263_v38 = vmul.f32 0.6931472, %v987_v33  ;;  %1008 = vlog2.f32 %v342_v36  ;;  %v327_v33 = vmul.f32 0.07739938, %v1165_v10  ;;  %v367_v1 = vmul.f32 0.07739938, %v1177_v20 }
  0x23   : > { %v991_v39 = vpop.eup %990  ;;  %v265_v40 = vmul.f32 0.6931472, %v989_v37  ;;  %v328_v37 = vmul.f32 0.07739938, %v1167_v11  ;;  %v370_v2 = vmul.f32 0.07739938, %v1183_v25 }
  0x24   : > { %v993_v41 = vpop.eup %992  ;;  %v267_v42 = vmul.f32 0.6931472, %v991_v39  ;;  %v270_v43 = vmul.f32 2.4, %v263_v38  ;;  %v329_v38 = vmul.f32 0.07739938, %v1169_v13 }
  0x25   : > { %v269_v44 = vmul.f32 0.6931472, %v993_v41  ;;  %v271_v45 = vmul.f32 2.4, %v265_v40  ;;  %v995_v48 = vpop.eup %994  ;;  %v330_v41 = vmul.f32 0.07739938, %v1171_v14 }
  0x26   : > { %v272_v46 = vmul.f32 2.4, %v267_v42  ;;  %v274_v47 = vmul.f32 1.442695, %v270_v43  ;;  %v997_v51 = vpop.eup %996  ;;  %v304_v53 = vmul.f32 0.6931472, %v995_v48 }
  0x27   : > { %v273_v49 = vmul.f32 2.4, %v269_v44  ;;  %v276_v50 = vmul.f32 1.442695, %v271_v45  ;;  %v999_v54 = vpop.eup %998  ;;  %v306_v57 = vmul.f32 0.6931472, %v997_v51 }
  0x28   : > { %1010 = vpow2.f32 %v274_v47  ;;  %v278_v52 = vmul.f32 1.442695, %v272_v46  ;;  %v1001_v58 = vpop.eup %1000  ;;  %v308_v60 = vmul.f32 0.6931472, %v999_v54  ;;  %v311_v61 = vmul.f32 2.4, %v304_v53 }
  0x29   : > { %1012 = vpow2.f32 %v276_v50  ;;  %v280_v55 = vmul.f32 1.442695, %v273_v49  ;;  %v310_v63 = vmul.f32 0.6931472, %v1001_v58  ;;  %v312_v4 = vmul.f32 2.4, %v306_v57  ;;  %v1003_v5 = vpop.eup %1002 }
  0x2a   : > { %1014 = vpow2.f32 %v278_v52  ;;  %v313_v7 = vmul.f32 2.4, %v308_v60  ;;  %v315_v8 = vmul.f32 1.442695, %v311_v61  ;;  %v1005_v9 = vpop.eup %1004  ;;  %v344_v16 = vmul.f32 0.6931472, %v1003_v5 }
  0x2b   : > { %1016 = vpow2.f32 %v280_v55  ;;  %v314_v12 = vmul.f32 2.4, %v310_v63  ;;  %v317_v15 = vmul.f32 1.442695, %v312_v4  ;;  %v1007_v17 = vpop.eup %1006  ;;  %v346_v19 = vmul.f32 0.6931472, %v1005_v9 }
  0x2c   : > { %1018 = vpow2.f32 %v315_v8  ;;  %v319_v18 = vmul.f32 1.442695, %v313_v7  ;;  %v1009_v22 = vpop.eup %1008  ;;  %v348_v26 = vmul.f32 0.6931472, %v1007_v17  ;;  %v351_v27 = vmul.f32 2.4, %v344_v16 }
  0x2d   : > { %1020 = vpow2.f32 %v317_v15  ;;  %v321_v23 = vmul.f32 1.442695, %v314_v12  ;;  %v350_v28 = vmul.f32 0.6931472, %v1009_v22  ;;  %v352_v29 = vmul.f32 2.4, %v346_v19 }
  0x2e   : > { %1022 = vpow2.f32 %v319_v18  ;;  %v353_v30 = vmul.f32 2.4, %v348_v26  ;;  %v355_v31 = vmul.f32 1.442695, %v351_v27  ;;  %v368_v47 = vmul.f32 0.07739938, %v1179_v21 }
  0x2f   : > { %1024 = vpow2.f32 %v321_v23  ;;  %v354_v34 = vmul.f32 2.4, %v350_v28  ;;  %v357_v35 = vmul.f32 1.442695, %v352_v29  ;;  %v369_v48 = vmul.f32 0.07739938, %v1181_v24 }
  0x30   : > { %1026 = vpow2.f32 %v355_v31  ;;  %v359_v39 = vmul.f32 1.442695, %v353_v30  ;;  %v608_v52 = vlaneseq }
  0x31   : > { %1028 = vpow2.f32 %v357_v35  ;;  %v361_v42 = vmul.f32 1.442695, %v354_v34 }
  0x32   : > { %v1011_v32 = vpop.eup %1010  ;;  %1030 = vpow2.f32 %v359_v39 }
  0x33   : > { %v1013_v36 = vpop.eup %1012  ;;  %v1208_v44 = vsel %vm282_vm0, %v1011_v32, %v287_v56  ;;  %1032 = vpow2.f32 %v361_v42 }
  0x34   : > { %v1015_v40 = vpop.eup %1014  ;;  %v1212_v45 = vsel %vm283_vm1, %v1013_v36, %v288_v59  ;;  %v395_v50 = vmul.f32 0.212671, %v1208_v44  ;;  %v415_v55 = vmul.f32 0.019334, %v1208_v44 }
  0x35   : > { %v1017_v43 = vpop.eup %1016  ;;  %v1217_v46 = vsel %vm284_vm2, %v1015_v40, %v289_v62  ;;  %v396_v51 = vmul.f32 0.212671, %v1212_v45  ;;  %v416_v56 = vmul.f32 0.019334, %v1212_v45 }
  0x36   : > { %v1223_v0 = vsel %vm285_vm3, %v1017_v43, %v290_v6  ;;  %v1019_v49 = vpop.eup %1018  ;;  %v397_v54 = vmul.f32 0.212671, %v1217_v46  ;;  %v417_v4 = vmul.f32 0.019334, %v1217_v46 }
  0x37   : > { %v1021_v53 = vpop.eup %1020  ;;  %v1233_v3 = vsel %vm323_vm4, %v1019_v49, %v327_v33  ;;  %v398_v59 = vmul.f32 0.212671, %v1223_v0  ;;  %v418_v7 = vmul.f32 0.019334, %v1223_v0  ;;  %v611_v49 = vand.u32 127, %v608_v52 }
  0x38   : > { %v1023_v57 = vpop.eup %1022  ;;  %v1240_v58 = vsel %vm324_vm5, %v1021_v53, %v328_v37  ;;  %v399_v60 = vmul.f32 0.71516, %v1233_v3  ;;  %v419_v61 = vmul.f32 0.119193, %v1233_v3 }
  0x39   : > { %v1025_v10 = vpop.eup %1024  ;;  %v1247_v62 = vsel %vm325_vm6, %v1023_v57, %v329_v38  ;;  %v400_v63 = vmul.f32 0.71516, %v1240_v58  ;;  %v420_v5 = vmul.f32 0.119193, %v1240_v58  ;;  %v375_v57 = vmul.f32 0.412453, %v1208_v44 }
  0x3a   : > { %v1254_v11 = vsel %vm326_vm7, %v1025_v10, %v330_v41  ;;  %v401_v6 = vmul.f32 0.71516, %v1247_v62  ;;  %v421_v8 = vmul.f32 0.119193, %v1247_v62  ;;  %v1027_v9 = vpop.eup %1026  ;;  %v403_v12 = vadd.f32 %v399_v60, %v395_v50 }
  0x3b   : > { %v402_v13 = vmul.f32 0.71516, %v1254_v11  ;;  %v404_v15 = vadd.f32 %v400_v63, %v396_v51  ;;  %v422_v16 = vmul.f32 0.119193, %v1254_v11  ;;  %v1029_v17 = vpop.eup %1028  ;;  %v1263_v18 = vsel %vm363_vm8, %v1027_v9, %v367_v1 }
  0x3c   : > { %v405_v14 = vadd.f32 %v401_v6, %v397_v54  ;;  %v423_v19 = vadd.f32 %v419_v61, %v415_v55  ;;  %v424_v22 = vadd.f32 %v420_v5, %v416_v56  ;;  %v1031_v23 = vpop.eup %1030  ;;  %v1267_v26 = vsel %vm364_vm9, %v1029_v17, %v368_v47 }
  0x3d   : > { %v406_v27 = vadd.f32 %v402_v13, %v398_v59  ;;  %v407_v28 = vmul.f32 0.072169, %v1263_v18  ;;  %v425_v29 = vadd.f32 %v421_v8, %v417_v4  ;;  %v1033_v30 = vpop.eup %1032  ;;  %v1272_v31 = vsel %vm365_vm10, %v1031_v23, %v369_v48 }
  0x3e   : > { %v408_v20 = vmul.f32 0.072169, %v1267_v26  ;;  %v427_v32 = vmul.f32 0.950227, %v1263_v18  ;;  %v428_v33 = vmul.f32 0.950227, %v1267_v26  ;;  %v1279_v21 = vsel %vm366_vm11, %v1033_v30, %v370_v2 }
  0x3f   : > { %v409_v34 = vmul.f32 0.072169, %v1272_v31  ;;  %v1282_v35 = vadd.f32 %v407_v28, %v403_v12  ;;  %v426_v36 = vadd.f32 %v422_v16, %v418_v7  ;;  %v410_v37 = vmul.f32 0.072169, %v1279_v21 }
  0x40   : > { %v1285_v24 = vadd.f32 %v408_v20, %v404_v15  ;;  %v429_v38 = vmul.f32 0.950227, %v1272_v31  ;;  %v430_v39 = vmul.f32 0.950227, %v1279_v21  ;;  %v431_v42 = vadd.f32 %v427_v32, %v423_v19 }
  0x41   : > { %v1289_v40 = vadd.f32 %v409_v34, %v405_v14  ;;  %v481_v41 = vmax.f32 %v1282_v35, 0.008856  ;;  %v1292_v25 = vadd.f32 %v410_v37, %v406_v27  ;;  %v432_v43 = vadd.f32 %v428_v33, %v424_v22 }
  0x42   : > { %v482_v1 = vmax.f32 %v1285_v24, 0.008856  ;;  %v609_v48 = vshrl.u32 %v608_v52, 7  ;;  %v433_v2 = vadd.f32 %v429_v38, %v425_v29  ;;  %v434_v50 = vadd.f32 %v430_v39, %v426_v36 }
  0x43   : > { %v483_v47 = vmax.f32 %v1289_v40, 0.008856  ;;  %1034 = vlog2.f32 %v481_v41  ;;  %v484_v51 = vmax.f32 %v1292_v25, 0.008856  ;;  %v1297_v53 = vmul.f32 0.91841704, %v431_v42 }
  0x44   : > { %1036 = vlog2.f32 %v482_v1  ;;  %v1299_v54 = vmul.f32 0.91841704, %v432_v43  ;;  %v612_v55 = vadd.s32 128, %v611_v49  ;;  %v618_v56 = vmul.u32 512, %v609_v48 }
  0x45   : > { %1038 = vlog2.f32 %v483_v47  ;;  %v376_v59 = vmul.f32 0.412453, %v1212_v45  ;;  %v1303_v60 = vmul.f32 0.91841704, %v433_v2  ;;  %v1305_v52 = vmul.f32 0.91841704, %v434_v50 }
  0x46   : > { %1040 = vlog2.f32 %v484_v51  ;;  %v526_v61 = vmax.f32 %v1297_v53, 0.008856  ;;  %v527_v10 = vmax.f32 %v1299_v54, 0.008856  ;;  %v377_v63 = vmul.f32 0.412453, %v1217_v46 }
  0x47   : > { %v379_v4 = vmul.f32 0.35758, %v1233_v3  ;;  %v528_v5 = vmax.f32 %v1303_v60, 0.008856  ;;  %v529_v6 = vmax.f32 %v1305_v52, 0.008856  ;;  %v1314_v8 = vadd.s32 %v618_v56, %v611_v49 }
  0x48   : > { %1042 = vlog2.f32 %v526_v61  ;;  %v380_v44 = vmul.f32 0.35758, %v1240_v58  ;;  %v613_v45 = vadd.s32 256, %v611_v49  ;;  %v614_v7 = vadd.s32 384, %v611_v49 }
  0x49   : > { %1044 = vlog2.f32 %v527_v10  ;;  %v1316_v9 = vadd.s32 %v618_v56, %v612_v55  ;;  %v378_v13 = vmul.f32 0.412453, %v1223_v0  ;;  %v381_v46 = vmul.f32 0.35758, %v1247_v62 }
  0x4a   : > { %1046 = vlog2.f32 %v528_v5  ;;  %v1321_v12 = vmul.f32 7.787, %v1282_v35  ;;  %v382_v15 = vmul.f32 0.35758, %v1254_v11  ;;  %v383_v58 = vadd.f32 %v379_v4, %v375_v57 }
  0x4b   : > { %1048 = vlog2.f32 %v529_v6  ;;  %v1325_v14 = vmul.f32 7.787, %v1285_v24  ;;  %v384_v19 = vadd.f32 %v380_v44, %v376_v59  ;;  %v385_v22 = vadd.f32 %v381_v46, %v377_v63 }
  0x4c   : > { %v1327_v0 = vadd.s32 %v618_v56, %v613_v45  ;;  %v387_v62 = vmul.f32 0.180423, %v1263_v18  ;;  %v388_v28 = vmul.f32 0.180423, %v1267_v26  ;;  %v386_v11 = vadd.f32 %v382_v15, %v378_v13 }
  0x4d   : > { %v1035_v3 = vpop.eup %1034  ;;  %v389_v32 = vmul.f32 0.180423, %v1272_v31  ;;  %v390_v36 = vmul.f32 0.180423, %v1279_v21  ;;  %v1333_v18 = vadd.s32 %v618_v56, %v614_v7  ;;  %vm505_vm12 = vcmp.gt.f32.partialorder %v1282_v35, 0.008856 }
  0x4e   : > { %v1037_v16 = vpop.eup %1036  ;;  %v486_v17 = vmul.f32 0.6931472, %v1035_v3  ;;  %v391_v37 = vadd.f32 %v387_v62, %v383_v58  ;;  %v392_v41 = vadd.f32 %v388_v28, %v384_v19  ;;  %vm506_vm13 = vcmp.gt.f32.partialorder %v1285_v24, 0.008856 }
  0x4f   : > { %v1039_v23 = vpop.eup %1038  ;;  %v488_v27 = vmul.f32 0.6931472, %v1037_v16  ;;  %v393_v42 = vadd.f32 %v389_v32, %v385_v22  ;;  %v394_v51 = vadd.f32 %v390_v36, %v386_v11  ;;  %v511_v5 = vmul.f32 7.787, %v1289_v40 }
  0x50   : > { %v1041_v29 = vpop.eup %1040  ;;  %v490_v30 = vmul.f32 0.6931472, %v1039_v23  ;;  %v493_v20 = vmul.f32 0.33333334, %v486_v17  ;;  %v1335_v26 = vmul.f32 1.0521111, %v391_v37 }
  0x51   : > { %v492_v33 = vmul.f32 0.6931472, %v1041_v29  ;;  %v494_v34 = vmul.f32 0.33333334, %v488_v27  ;;  %v1338_v31 = vmul.f32 1.0521111, %v392_v41 }
  0x52   : > { %v495_v38 = vmul.f32 0.33333334, %v490_v30  ;;  %v497_v39 = vmul.f32 1.442695, %v493_v20  ;;  %v1043_v47 = vpop.eup %1042  ;;  %v1340_v49 = vmul.f32 1.0521111, %v393_v42 }
  0x53   : > { %v496_v43 = vmul.f32 0.33333334, %v492_v33  ;;  %v499_v1 = vmul.f32 1.442695, %v494_v34  ;;  %v1045_v21 = vpop.eup %1044  ;;  %v531_v50 = vmul.f32 0.6931472, %v1043_v47 }
  0x54   : > { %1050 = vpow2.f32 %v497_v39  ;;  %v501_v48 = vmul.f32 1.442695, %v495_v38  ;;  %v1047_v55 = vpop.eup %1046  ;;  %v533_v56 = vmul.f32 0.6931472, %v1045_v21  ;;  %v440_v57 = vmax.f32 %v1335_v26, 0.008856 }
  0x55   : > { %1052 = vpow2.f32 %v499_v1  ;;  %v503_v2 = vmul.f32 1.442695, %v496_v43  ;;  %v441_v59 = vmax.f32 %v1338_v31, 0.008856  ;;  %v1049_v61 = vpop.eup %1048  ;;  %v535_v10 = vmul.f32 0.6931472, %v1047_v55 }
  0x56   : > { %1054 = vpow2.f32 %v501_v48  ;;  %v538_v63 = vmul.f32 0.33333334, %v531_v50  ;;  %v442_v4 = vmax.f32 %v1340_v49, 0.008856  ;;  %v537_v6 = vmul.f32 0.6931472, %v1049_v61 }
  0x57   : > { %1056 = vpow2.f32 %v503_v2  ;;  %v539_v44 = vmul.f32 0.33333334, %v533_v56  ;;  %v540_v45 = vmul.f32 0.33333334, %v535_v10  ;;  %v1347_v13 = vmul.f32 1.0521111, %v394_v51 }
  0x58   : > { %1058 = vlog2.f32 %v440_v57  ;;  %v542_v7 = vmul.f32 1.442695, %v538_v63  ;;  %v512_v46 = vmul.f32 7.787, %v1292_v25  ;;  %v541_v3 = vmul.f32 0.33333334, %v537_v6 }
  0x59   : > { %1060 = vlog2.f32 %v441_v59  ;;  %v544_v15 = vmul.f32 1.442695, %v539_v44  ;;  %vm507_vm14 = vcmp.gt.f32.partialorder %v1289_v40, 0.008856  ;;  %v513_v58 = vadd.f32 0.13793103, %v1321_v12 }
  0x5a   : > { %1062 = vlog2.f32 %v442_v4  ;;  %v546_v16 = vmul.f32 1.442695, %v540_v45  ;;  %vm623_vm15 = vcmp.lt.s32.totalorder %v1314_v8, 256  ;;  %vm508_vm0 = vcmp.gt.f32.partialorder %v1292_v25, 0.008856 }
  0x5b   : > { %1064 = vpow2.f32 %v542_v7  ;;  %v514_v17 = vadd.f32 0.13793103, %v1325_v14  ;;  %v548_v19 = vmul.f32 1.442695, %v541_v3  ;;  %vm624_vm1 = vcmp.lt.s32.totalorder %v1316_v9, 256 }
  0x5c   : > { %1066 = vpow2.f32 %v544_v15  ;;  %v515_v22 = vadd.f32 0.13793103, %v511_v5  ;;  %v554_v23 = vmul.f32 7.787, %v1297_v53  ;;  %vm625_vm2 = vcmp.lt.s32.totalorder %v1327_v0, 256 }
  0x5d   : > { %1068 = vpow2.f32 %v546_v16  ;;  %v443_v12 = vmax.f32 %v1347_v13, 0.008856  ;;  %v516_v62 = vadd.f32 0.13793103, %v512_v46  ;;  %vm550_vm3 = vcmp.gt.f32.partialorder %v1297_v53, 0.008856 }
  0x5e   : > { %v1051_v27 = vpop.eup %1050  ;;  %1070 = vpow2.f32 %v548_v19  ;;  %v555_v14 = vmul.f32 7.787, %v1299_v54  ;;  %vm626_vm4 = vcmp.lt.s32.totalorder %v1333_v18, 256  ;;  %vm551_vm5 = vcmp.gt.f32.partialorder %v1299_v54, 0.008856 }
  0x5f   : > { %v1053_v28 = vpop.eup %1052  ;;  %v1364_v29 = vsel %vm505_vm12, %v1051_v27, %v513_v58  ;;  %vm552_vm6 = vcmp.gt.f32.partialorder %v1303_v60, 0.008856  ;;  %v556_v30 = vmul.f32 7.787, %v1303_v60  ;;  %vm553_vm7 = vcmp.gt.f32.partialorder %v1305_v52, 0.008856 }
  0x60   : > { %v1055_v20 = vpop.eup %1054  ;;  %v1371_v11 = vsel %vm506_vm13, %v1053_v28, %v514_v17  ;;  %v557_v32 = vmul.f32 7.787, %v1305_v52  ;;  %v566_v33 = vmul.f32 116.0, %v1364_v29  ;;  %v558_v24 = vadd.f32 0.13793103, %v554_v23 }
  0x61   : > { %v1057_v35 = vpop.eup %1056  ;;  %v1385_v34 = vsel %vm507_vm14, %v1055_v20, %v515_v22  ;;  %v567_v36 = vmul.f32 116.0, %v1371_v11  ;;  %1072 = vlog2.f32 %v443_v12  ;;  %v559_v39 = vadd.f32 0.13793103, %v555_v14 }
  0x62   : > { %v1059_v37 = vpop.eup %1058  ;;  %v1390_v38 = vsel %vm508_vm0, %v1057_v35, %v516_v62  ;;  %v568_v41 = vmul.f32 116.0, %v1385_v34  ;;  %v921_v42 = vadd.f32 -16.0, %v566_v33  ;;  %v560_v1 = vadd.f32 0.13793103, %v556_v30 }
  0x63   : > { %v1061_v43 = vpop.eup %1060  ;;  %v569_v40 = vmul.f32 116.0, %v1390_v38  ;;  %v922_v47 = vadd.f32 -16.0, %v567_v36  ;;  %v445_v48 = vmul.f32 0.6931472, %v1059_v37  ;;  %v561_v2 = vadd.f32 0.13793103, %v557_v32 }
  0x64   : > { %v1063_v21 = vpop.eup %1062  ;;  %v923_v50 = vadd.f32 -16.0, %v568_v41  ;;  %v933_v51 = vadd.f32 -50.0, %v921_v42  ;;  %590 = vst [vmem:[%s1381_s22] sm:$0xff] %v921_v42  ;;  %v447_v25 = vmul.f32 0.6931472, %v1061_v43  ;;  %vm465_vm8 = vcmp.gt.f32.partialorder %v1335_v26, 0.008856 }
  0x65   : > { %v1065_v55 = vpop.eup %1064  ;;  %v924_v56 = vadd.f32 -16.0, %v569_v40  ;;  %591 = vst [vmem:[%s1381_s22 + $0x8] sm:$0xff] %v922_v47  ;;  %v934_v57 = vadd.f32 -50.0, %v922_v47  ;;  %v449_v59 = vmul.f32 0.6931472, %v1063_v21  ;;  %vm232_vm12 = vcmask 0  }
  0x66   : > { %v453_v61 = vmul.f32 0.33333334, %v445_v48  ;;  %v1067_v10 = vpop.eup %1066  ;;  %v562_v63 = vsel %vm550_vm3, %v1065_v55, %v558_v24  ;;  %592 = vst [vmem:[%s1381_s22 + $0x10] sm:$0xff] %v923_v50  ;;  %v935_v4 = vadd.f32 -50.0, %v923_v50  ;;  %v627_v5 = vsel %vm623_vm15, %v933_v51, 0.0 }
  0x67   : > { %v454_v6 = vmul.f32 0.33333334, %v447_v25  ;;  %v1069_v44 = vpop.eup %1068  ;;  %v563_v45 = vsel %vm551_vm5, %v1067_v10, %v559_v39  ;;  %v582_v7 = vsub.f32 %v1364_v29, %v562_v63  ;;  %593 = vst [vmem:[%s1381_s22 + $0x18] sm:$0xff] %v924_v56  ;;  %v936_v46 = vadd.f32 -50.0, %v924_v56 }
  0x68   : > { %v628_v3 = vsel %vm624_vm1, %v934_v57, 0.0  ;;  %v1071_v15 = vpop.eup %1070  ;;  %v564_v53 = vsel %vm552_vm6, %v1069_v44, %v560_v1  ;;  %v583_v58 = vsub.f32 %v1371_v11, %v563_v45  ;;  %v629_v16 = vsel %vm625_vm2, %v935_v4, 0.0 }
  0x69   : > { %v640_v17 = vadd.f32 %v628_v3, %v627_v5  ;;  %v565_v54 = vsel %vm553_vm7, %v1071_v15, %v561_v2  ;;  %v584_v19 = vsub.f32 %v1385_v34, %v564_v53  ;;  %v586_v22 = vmul.f32 200.0, %v582_v7 }
  0x6a   : > { %v630_v23 = vsel %vm626_vm4, %v936_v46, 0.0  ;;  %v585_v60 = vsub.f32 %v1390_v38, %v565_v54  ;;  %v587_v12 = vmul.f32 200.0, %v583_v58  ;;  %v691_v62 = vmul.f32 %v627_v5, %v627_v5 }
  0x6b   : > { %v641_v27 = vadd.f32 %v640_v17, %v629_v16  ;;  %v1073_v14 = vpop.eup %1072  ;;  %v588_v28 = vmul.f32 200.0, %v584_v19  ;;  %v635_v52 = vsel %vm623_vm15, %v586_v22, 0.0  ;;  %929 = vst [vmem:[%s1381_s22 + $0x40] sm:$0xff] %v586_v22  ;;  %v692_v30 = vmul.f32 %v628_v3, %v628_v3 }
  0x6c   : > { %v693_v20 = vmul.f32 %v629_v16, %v629_v16  ;;  %v589_v32 = vmul.f32 200.0, %v585_v60  ;;  %930 = vst [vmem:[%s1381_s22 + $0x48] sm:$0xff] %v587_v12  ;;  %v636_v33 = vsel %vm624_vm1, %v587_v12, 0.0  ;;  %v733_v35 = vmul.f32 %v635_v52, %v635_v52 }
  0x6d   : > { %v642_v24 = vadd.f32 %v641_v27, %v630_v23  ;;  %931 = vst [vmem:[%s1381_s22 + $0x50] sm:$0xff] %v588_v28  ;;  %v637_v36 = vsel %vm625_vm2, %v588_v28, 0.0  ;;  %v675_v37 = vadd.f32 %v636_v33, %v635_v52  ;;  %v734_v39 = vmul.f32 %v636_v33, %v636_v33 }
  0x6e   : > { %932 = vst [vmem:[%s1381_s22 + $0x58] sm:$0xff] %v589_v32  ;;  %v638_v41 = vsel %vm626_vm4, %v589_v32, 0.0  ;;  %v694_v42 = vmul.f32 %v630_v23, %v630_v23  ;;  %v695_v43 = vadd.f32 %v692_v30, %v691_v62  ;;  %v451_v1 = vmul.f32 0.6931472, %v1073_v14 }
  0x6f   : > { %643 = vadd.xlane.f32.xlu0 %v642_v24  ;;  %v676_v40 = vadd.f32 %v675_v37, %v637_v36  ;;  %v735_v47 = vmul.f32 %v637_v36, %v637_v36  ;;  %v455_v48 = vmul.f32 0.33333334, %v449_v59  ;;  %v457_v21 = vmul.f32 1.442695, %v453_v61 }
  0x70   : > { %v696_v2 = vadd.f32 %v695_v43, %v693_v20  ;;  %v456_v50 = vmul.f32 0.33333334, %v451_v1  ;;  %v459_v51 = vmul.f32 1.442695, %v454_v6  ;;  %v737_v25 = vadd.f32 %v734_v39, %v733_v35 }
  0x71   : > { %v677_v55 = vadd.f32 %v676_v40, %v638_v41  ;;  %1074 = vpow2.f32 %v457_v21  ;;  %v461_v56 = vmul.f32 1.442695, %v455_v48  ;;  %v736_v10 = vmul.f32 %v638_v41, %v638_v41 }
  0x72   : > { %1076 = vpow2.f32 %v459_v51  ;;  %v463_v57 = vmul.f32 1.442695, %v456_v50  ;;  %v697_v63 = vadd.f32 %v696_v2, %v694_v42  ;;  %v738_v4 = vadd.f32 %v737_v25, %v735_v47 }
  0x73   : > { %678 = vadd.xlane.f32.xlu1 %v677_v55  ;;  %1078 = vpow2.f32 %v461_v56  ;;  %v469_v5 = vmul.f32 7.787, %v1335_v26  ;;  %v470_v59 = vmul.f32 7.787, %v1338_v31  ;;  %v471_v61 = vmul.f32 7.787, %v1340_v49 }
  0x74   : > { %1080 = vpow2.f32 %v463_v57  ;;  %v472_v6 = vmul.f32 7.787, %v1347_v13  ;;  %v739_v44 = vadd.f32 %v738_v4, %v736_v10  ;;  %vm466_vm9 = vcmp.gt.f32.partialorder %v1338_v31, 0.008856 }
  0x75   : > { %v473_v45 = vadd.f32 0.13793103, %v469_v5  ;;  %v474_v7 = vadd.f32 0.13793103, %v470_v59  ;;  %v475_v46 = vadd.f32 0.13793103, %v471_v61 }
  0x76   : > { %vm467_vm10 = vcmp.gt.f32.partialorder %v1340_v49, 0.008856  ;;  %v476_v15 = vadd.f32 0.13793103, %v472_v6  ;;  %vm468_vm11 = vcmp.gt.f32.partialorder %v1347_v13, 0.008856 }
  0x77   : > { %698 = vadd.xlane.f32.xlu1 %v697_v63  ;;  %v1106_v0 = vmov 0.0  }
  0x78   : > { %233 = vst.msk [vmem:[%s1458_s26] sm:$0x1] %vm232_vm12, %v1106_v0  ;;  %234 = vst.msk [vmem:[%s1458_s26 + $0x1] sm:$0x1] %vm232_vm12, %v1106_v0 }
  0x79   : > { %235 = vst.msk [vmem:[%s1458_s26 + $0x2] sm:$0x1] %vm232_vm12, %v1106_v0  ;;  %236 = vst.msk [vmem:[%s1469_s29] sm:$0x1] %vm232_vm12, %v1106_v0 }
  0x7a   : > { %237 = vst.msk [vmem:[%s1469_s29 + $0x1] sm:$0x1] %vm232_vm12, %v1106_v0  ;;  %238 = vst.msk [vmem:[%s1469_s29 + $0x2] sm:$0x1] %vm232_vm12, %v1106_v0 }
  0x7b   : > { %v1075_v3 = vpop.eup %1074  ;;  %740 = vadd.xlane.f32.xlu1 %v739_v44 }
  0x7c   : > { %v1077_v53 = vpop.eup %1076  ;;  %v477_v58 = vsel %vm465_vm8, %v1075_v3, %v473_v45 }
  0x7d   : > { %v1079_v16 = vpop.eup %1078  ;;  %v478_v17 = vsel %vm466_vm9, %v1077_v53, %v474_v7  ;;  %v574_v54 = vsub.f32 %v477_v58, %v1364_v29 }
  0x7e   : > { %v1081_v26 = vpop.eup %1080  ;;  %v479_v19 = vsel %vm467_vm10, %v1079_v16, %v475_v46  ;;  %v575_v31 = vsub.f32 %v478_v17, %v1371_v11 }
  0x7f   : > { %v480_v22 = vsel %vm468_vm11, %v1081_v26, %v476_v15  ;;  %v576_v49 = vsub.f32 %v479_v19, %v1385_v34  ;;  %v578_v23 = vmul.f32 500.0, %v574_v54 }
  0x80   : > { %v577_v60 = vsub.f32 %v480_v22, %v1390_v38  ;;  %v579_v12 = vmul.f32 500.0, %v575_v31  ;;  %v639_v22 = vld [vmem:[%s1458_s26] sm:$0x1] }
  0x81   : > { %v580_v13 = vmul.f32 500.0, %v576_v49  ;;  %v631_v27 = vsel %vm623_vm15, %v578_v23, 0.0  ;;  %925 = vst [vmem:[%s1381_s22 + $0x20] sm:$0xff] %v578_v23 }
  0x82   : > { %v581_v62 = vmul.f32 500.0, %v577_v60  ;;  %926 = vst [vmem:[%s1381_s22 + $0x28] sm:$0xff] %v579_v12  ;;  %v632_v29 = vsel %vm624_vm1, %v579_v12, 0.0  ;;  %v712_v14 = vmul.f32 %v631_v27, %v631_v27  ;;  %v937_v60 = vld [vmem:[%s1458_s26 + $0x1] sm:$0x1] }
  0x83   : > { %927 = vst [vmem:[%s1381_s22 + $0x30] sm:$0xff] %v580_v13  ;;  %v633_v11 = vsel %vm625_vm2, %v580_v13, 0.0  ;;  %v658_v34 = vadd.f32 %v632_v29, %v631_v27  ;;  %v713_v28 = vmul.f32 %v632_v29, %v632_v29  ;;  %v939_v12 = vld [vmem:[%s1458_s26 + $0x2] sm:$0x1]  ;;  %v690_v27 = vld [vmem:[%s1469_s29] sm:$0x1] }
  0x84   : > { %928 = vst [vmem:[%s1381_s22 + $0x38] sm:$0xff] %v581_v62  ;;  %v634_v38 = vsel %vm626_vm4, %v581_v62, 0.0  ;;  %v714_v8 = vmul.f32 %v633_v11, %v633_v11 }
  0x85   : > { %v659_v52 = vadd.f32 %v658_v34, %v633_v11  ;;  %v715_v30 = vmul.f32 %v634_v38, %v634_v38  ;;  %v716_v20 = vadd.f32 %v713_v28, %v712_v14  ;;  %v941_v34 = vld [vmem:[%s1469_s29 + $0x1] sm:$0x1] }
  0x87   : > { %v660_v32 = vadd.f32 %v659_v52, %v634_v38  ;;  %v717_v33 = vadd.f32 %v716_v20, %v714_v8  ;;  %v943_v38 = vld [vmem:[%s1469_s29 + $0x2] sm:$0x1] }
  0x89   : > { %661 = vadd.xlane.f32.xlu0 %v660_v32  ;;  %v718_v9 = vadd.f32 %v717_v33, %v715_v30 }
  0x8d   : > { %719 = vadd.xlane.f32.xlu0 %v718_v9 }
  0xfc   : > { %v644_v18 = vpop.xlane.xlu0 %643 }
  0xfd   : > { %v645_v35 = vrot.slane %v644_v18, 4 }
  0xff   : > { %v646_v24 = vadd.f32 %v645_v35, %v644_v18 }
 0x100   : > { %v679_v37 = vpop.xlane.xlu1 %678 }
 0x101   : > { %v647_v36 = vrot.slane %v646_v24, 2  ;;  %v680_v47 = vrot.slane %v679_v37, 4 }
 0x103   : > { %v648_v39 = vadd.f32 %v647_v36, %v646_v24  ;;  %v681_v2 = vadd.f32 %v680_v47, %v679_v37 }
 0x104   : > { %v699_v43 = vpop.xlane.xlu1 %698 }
 0x105   : > { %v649_v41 = vrot.slane %v648_v39, 1  ;;  %v700_v1 = vrot.slane %v699_v43, 4  ;;  %v682_v25 = vrot.slane %v681_v2, 2 }
 0x107   : > { %v650_v42 = vadd.f32 %v649_v41, %v648_v39  ;;  %v701_v21 = vadd.f32 %v700_v1, %v699_v43  ;;  %v683_v5 = vadd.f32 %v682_v25, %v681_v2 }
 0x108   : > { %v741_v40 = vpop.xlane.xlu1 %740 }
 0x109   : > { %949 = vpush %v650_v42  ;;  %v742_v48 = vrot.slane %v741_v40, 4  ;;  %v702_v51 = vrot.slane %v701_v21, 2  ;;  %v684_v46 = vrot.slane %v683_v5, 1 }
 0x10b   : > { %v743_v50 = vadd.f32 %v742_v48, %v741_v40  ;;  %v703_v63 = vadd.f32 %v702_v51, %v701_v21  ;;  %v685_v54 = vadd.f32 %v684_v46, %v683_v5 }
 0x10d   : > { %v744_v57 = vrot.slane %v743_v50, 2  ;;  %v704_v7 = vrot.slane %v703_v63, 1 }
 0x10f   : > { %v745_v6 = vadd.f32 %v744_v57, %v743_v50  ;;  %v705_v17 = vadd.f32 %v704_v7, %v703_v63 }
 0x111   : > { %v746_v53 = vrot.slane %v745_v6, 1 }
 0x113   : > { %v747_v19 = vadd.f32 %v746_v53, %v745_v6 }
 0x116   : > { %v662_v55 = vpop.xlane.xlu0 %661 }
 0x117   : > { %v663_v56 = vrot.slane %v662_v55, 4 }
 0x119   : > { %v664_v10 = vadd.f32 %v663_v56, %v662_v55 }
 0x11a   : > { %v720_v4 = vpop.xlane.xlu0 %719 }
 0x11b   : > { %v665_v59 = vrot.slane %v664_v10, 2  ;;  %v721_v61 = vrot.slane %v720_v4, 4 }
 0x11d   : > { %v722_v44 = vadd.f32 %v721_v61, %v720_v4  ;;  %v666_v45 = vadd.f32 %v665_v59, %v664_v10 }
 0x11f   : > { %v723_v3 = vrot.slane %v722_v44, 2  ;;  %v667_v15 = vrot.slane %v666_v45, 1 }
 0x121   : > { %v724_v58 = vadd.f32 %v723_v3, %v722_v44  ;;  %v668_v16 = vadd.f32 %v667_v15, %v666_v45 }
 0x123   : > { %951 = vpush %v668_v16  ;;  %v725_v26 = vrot.slane %v724_v58, 1 }
 0x124   : > { %953 = vpush %v685_v54 }
 0x125   : > { %955 = vpush %v705_v17  ;;  %v726_v31 = vadd.f32 %v725_v26, %v724_v58 }
 0x127   : > { %957 = vpush %v726_v31 }
 0x128   : > { %959 = vpush %v747_v19 }
 0x13a   : > { %s950_s30 = spop %949 }
 0x13b   : > { %v652_v49 = vstv %s950_s30 }
 0x13c   : > { %v653_v23 = vadd.f32 %v652_v49, %v639_v22 }
 0x13e   : > { %655 = vst.msk [vmem:[%s1458_s26] sm:$0x1] %vm232_vm12, %v653_v23 }
 0x154   : > { %s952_s4 = spop %951 }
 0x155   : > { %v670_v13 = vstv %s952_s4  ;;  %s954_s5 = spop %953 }
 0x156   : > { %v671_v62 = vadd.f32 %v937_v60, %v670_v13  ;;  %v687_v29 = vstv %s954_s5  ;;  %s956_s6 = spop %955 }
 0x157   : > { %v688_v14 = vadd.f32 %v939_v12, %v687_v29  ;;  %v707_v11 = vstv %s956_s6 }
 0x158   : > { %938 = vst.msk [vmem:[%s1458_s26 + $0x1] sm:$0x1] %vm232_vm12, %v671_v62  ;;  %v708_v28 = vadd.f32 %v707_v11, %v690_v27  ;;  %s958_s7 = spop %957 }
 0x159   : > { %940 = vst.msk [vmem:[%s1458_s26 + $0x2] sm:$0x1] %vm232_vm12, %v688_v14  ;;  %v728_v8 = vstv %s958_s7  ;;  %s960_s8 = spop %959 }
 0x15a   : > { %709 = vst.msk [vmem:[%s1469_s29] sm:$0x1] %vm232_vm12, %v708_v28  ;;  %v729_v52 = vadd.f32 %v941_v34, %v728_v8  ;;  %v749_v30 = vstv %s960_s8 }
 0x15b   : > { %v750_v20 = vadd.f32 %v943_v38, %v749_v30 }
 0x15c   : > { %942 = vst.msk [vmem:[%s1469_s29 + $0x1] sm:$0x1] %vm232_vm12, %v729_v52 }
 0x15d   : > { %944 = vst.msk [vmem:[%s1469_s29 + $0x2] sm:$0x1] %vm232_vm12, %v750_v20 }
 0x15e PF: > { %s14_s14 = sadd.s32 1, %s1104_s14   ;;  %s1508_s12 = smov %s1100_s13 }
 0x15f   : > { %p11_p5 = scmp.ge.s32.totalorder %s14_s14, 4   ;;  %s1509_s13 = smov %s1511_s15 }
 0x161   :  { %13 = sbr.rel (!%p11_p5) target bundleno = 2 (0x2), region = 90 }

// kernel: template_norm_forward.3
= control target key start
LH: loop header
LB: loop body
LE: loop exit
PB: predicated region body
PF: predicated region fallthrough
CT: control target
= control target key end

     0   :  { %s955_s12 = smov 0   ;;  %s957_s13 = smov 0   ;;  %s1176_s0 = inlined_call_operand.vmem [shape: f32[2,3,8,512], index: 0, kind: input, shape index: {}]   ;;  %s1177_s1 = inlined_call_operand.vmem [shape: f32[2,3,1,1], index: 1, kind: input, shape index: {}]   ;;  %s1178_s2 = inlined_call_operand.vmem [shape: f32[2,3,1,1], index: 2, kind: input, shape index: {}]   ;;  %s1179_s3 = inlined_call_operand.vmem [shape: f32[2,3,8,512], index: 3, kind: output, shape index: {}]  }
   0x1   :  { %s959_s14 = smov 0  }
   0x2 LB: > { %s25_s15 = sadd.s32 1, %s928_s13  ;;  %p778_p0 = scmp.ge.s32.totalorder %s932_s14, 1  ;;  %s932_s14 = sphi %s959_s14, %s13_s14   ;;  %s928_s13 = sphi %s957_s13, %s1181_s13   ;;  %s924_s12 = sphi %s955_s12, %s1180_s12  }
   0x3   : > { %p27_p1 = scmp.ge.s32.totalorder %s25_s15, 2  ;;  %p175_p2 = scmp.lt.s32.totalorder %s932_s14, 3 }
   0x5   : > { %s1183_s15 = smov (%p27_p1, %s25_s15), 0  ;;  %p176_p3 = pnand %p778_p0, %p175_p2 }
   0x6   : > { %p215_p4 = scmp.lt.s32.totalorder (!%p176_p3), %s924_s12, 1  ;;  %v934_v0 = vmov (!%p176_p3), 0  }
   0x7   : > { %179 = sbr.rel (%p176_p3) target bundleno = 241 (0xf1), region = 32  ;;  %861 = vset.pattern.permute.xlu1 (!%p176_p3), %v934_v0  ;;  %860 = vset.pattern.permute.xlu0 (!%p176_p3), %v934_v0 }
   0xe   : > { %s1185_s12 = smov (!%p215_p4, %s924_s12), 1 }
   0xf   : > { %s834_s16 = smul.u32 3, %s1185_s12 }
  0x10   : > { %s833_s23 = smul.u32 96, %s1185_s12 }
  0x11   : > { %s227_s19 = scalar_lea.vmem %s1177_s1, %s834_s16  ;;  %s231_s22 = scalar_lea.vmem %s1178_s2, %s834_s16 }
  0x12   : > { %v788_v1 = vld [vmem:[%s227_s19 + $0x1] ss:$0 sm:$0xff]  ;;  %v781_v2 = vld [vmem:[%s227_s19] ss:$0 sm:$0xff]  ;;  %v798_v5 = vld [vmem:[%s231_s22 + $0x2] ss:$0 sm:$0xff]  ;;  %s988_s26 = scalar_lea.vmem %s1176_s0, %s833_s23  ;;  %s1117_s29 = scalar_lea.vmem %s1179_s3, %s833_s23 }
  0x13   : > { %286 = vperm.xlu1 %861, %v788_v1   ;;  %252 = vperm.xlu0 %860, %v781_v2   ;;  %v790_v3 = vld [vmem:[%s231_s22 + $0x1] ss:$0 sm:$0xff]  ;;  %v782_v4 = vld [vmem:[%s231_s22] ss:$0 sm:$0xff]  ;;  %v796_v6 = vld [vmem:[%s227_s19 + $0x2] ss:$0 sm:$0xff] }
  0x14   : > { %v783_v7 = vld [vmem:[%s988_s26 + $0x20] sm:$0xff]  ;;  %v784_v8 = vld [vmem:[%s988_s26 + $0x28] sm:$0xff]  ;;  %v785_v9 = vld [vmem:[%s988_s26 + $0x30] sm:$0xff] }
  0x15   : > { %v786_v11 = vld [vmem:[%s988_s26 + $0x38] sm:$0xff]  ;;  %v241_v13 = vld [vmem:[%s988_s26] sm:$0xff]  ;;  %v242_v17 = vld [vmem:[%s988_s26 + $0x8] sm:$0xff] }
  0x16   : > { %v243_v18 = vld [vmem:[%s988_s26 + $0x10] sm:$0xff]  ;;  %v244_v19 = vld [vmem:[%s988_s26 + $0x18] sm:$0xff]  ;;  %v791_v40 = vld [vmem:[%s988_s26 + $0x40] sm:$0xff] }
  0x17   : > { %301 = vperm.xlu1 %861, %v790_v3   ;;  %266 = vperm.xlu0 %860, %v782_v4   ;;  %v792_v44 = vld [vmem:[%s988_s26 + $0x48] sm:$0xff]  ;;  %v793_v50 = vld [vmem:[%s988_s26 + $0x50] sm:$0xff]  ;;  %v794_v55 = vld [vmem:[%s988_s26 + $0x58] sm:$0xff] }
  0x1b   : > { %336 = vperm.xlu1 %861, %v798_v5   ;;  %321 = vperm.xlu0 %860, %v796_v6  }
  0x92   : > { %v287_v10 = vpop.permute.xlu1 %286  ;;  %v253_v12 = vpop.permute.xlu0 %252 }
  0x93   : > { %v289_v14 = vmul.f32 %v783_v7, %v287_v10  ;;  %v290_v15 = vmul.f32 %v784_v8, %v287_v10  ;;  %v291_v16 = vmul.f32 %v785_v9, %v287_v10  ;;  %v292_v20 = vmul.f32 %v786_v11, %v287_v10 }
  0x94   : > { %v255_v21 = vmul.f32 %v253_v12, %v241_v13  ;;  %v256_v22 = vmul.f32 %v253_v12, %v242_v17  ;;  %v257_v23 = vmul.f32 %v253_v12, %v243_v18  ;;  %v258_v24 = vmul.f32 %v253_v12, %v244_v19 }
  0x96   : > { %v302_v25 = vpop.permute.xlu1 %301  ;;  %v267_v26 = vpop.permute.xlu0 %266 }
  0x97   : > { %v304_v27 = vadd.f32 %v302_v25, %v289_v14  ;;  %v305_v28 = vadd.f32 %v302_v25, %v290_v15  ;;  %v306_v29 = vadd.f32 %v302_v25, %v291_v16  ;;  %v269_v30 = vadd.f32 %v267_v26, %v255_v21 }
  0x98   : > { %v270_v31 = vadd.f32 %v267_v26, %v256_v22  ;;  %v271_v32 = vadd.f32 %v267_v26, %v257_v23  ;;  %v272_v33 = vadd.f32 %v267_v26, %v258_v24  ;;  %v307_v34 = vadd.f32 %v302_v25, %v292_v20 }
  0x99   : > { %v353_v35 = vmul.f32 0.002, %v304_v27  ;;  %v343_v36 = vadd.f32 16.0, %v269_v30  ;;  %v354_v41 = vmul.f32 0.002, %v305_v28 }
  0x9a   : > { %v344_v37 = vadd.f32 16.0, %v270_v31  ;;  %v345_v38 = vadd.f32 16.0, %v271_v32  ;;  %v322_v39 = vpop.permute.xlu0 %321  ;;  %v355_v42 = vmul.f32 0.002, %v306_v29  ;;  %v346_v43 = vadd.f32 16.0, %v272_v33  ;;  %v337_v61 = vpop.permute.xlu1 %336 }
  0x9b   : > { %v1000_v45 = vmul.f32 0.00862069, %v343_v36  ;;  %v356_v48 = vmul.f32 0.002, %v307_v34  ;;  %v324_v51 = vmul.f32 %v791_v40, %v322_v39  ;;  %v325_v56 = vmul.f32 %v792_v44, %v322_v39 }
  0x9c   : > { %v1002_v46 = vmul.f32 0.00862069, %v344_v37  ;;  %v1004_v47 = vmul.f32 0.00862069, %v345_v38  ;;  %v1006_v49 = vmul.f32 0.00862069, %v346_v43  ;;  %v326_v58 = vmul.f32 %v793_v50, %v322_v39 }
  0x9d   : > { %v357_v52 = vadd.f32 %v353_v35, %v1000_v45  ;;  %v327_v62 = vmul.f32 %v794_v55, %v322_v39  ;;  %v339_v1 = vadd.f32 %v337_v61, %v324_v51  ;;  %v340_v2 = vadd.f32 %v337_v61, %v325_v56 }
  0x9e   : > { %v358_v53 = vadd.f32 %v354_v41, %v1002_v46  ;;  %v359_v54 = vadd.f32 %v355_v42, %v1004_v47  ;;  %v360_v57 = vadd.f32 %v356_v48, %v1006_v49  ;;  %v341_v7 = vadd.f32 %v337_v61, %v326_v58 }
  0x9f   : > { %v374_v59 = vmul.f32 %v357_v52, %v357_v52  ;;  %v799_v0 = vadd.f32 -0.13793103, %v357_v52  ;;  %vm370_vm0 = vcmp.gt.f32.partialorder %v357_v52, 0.2068966  ;;  %v403_v10 = vmul.f32 %v1000_v45, %v1000_v45 }
  0xa0   : > { %v375_v60 = vmul.f32 %v358_v53, %v358_v53  ;;  %v376_v63 = vmul.f32 %v359_v54, %v359_v54  ;;  %v377_v3 = vmul.f32 %v360_v57, %v360_v57  ;;  %v800_v4 = vadd.f32 -0.13793103, %v358_v53 }
  0xa1   : > { %v801_v5 = vadd.f32 -0.13793103, %v359_v54  ;;  %v802_v6 = vadd.f32 -0.13793103, %v360_v57  ;;  %vm371_vm1 = vcmp.gt.f32.partialorder %v358_v53, 0.2068966  ;;  %v378_v8 = vmul.f32 %v374_v59, %v357_v52 }
  0xa2   : > { %vm372_vm2 = vcmp.gt.f32.partialorder %v359_v54, 0.2068966  ;;  %vm373_vm3 = vcmp.gt.f32.partialorder %v360_v57, 0.2068966  ;;  %v379_v9 = vmul.f32 %v375_v60, %v358_v53  ;;  %v380_v11 = vmul.f32 %v376_v63, %v359_v54 }
  0xa3   : > { %v387_v12 = vmul.f32 0.12841916, %v799_v0  ;;  %v404_v13 = vmul.f32 %v1002_v46, %v1002_v46  ;;  %v405_v14 = vmul.f32 %v1004_v47, %v1004_v47  ;;  %v381_v15 = vmul.f32 %v377_v3, %v360_v57 }
  0xa4   : > { %v388_v16 = vmul.f32 0.12841916, %v800_v4  ;;  %v389_v17 = vmul.f32 0.12841916, %v801_v5  ;;  %v390_v18 = vmul.f32 0.12841916, %v802_v6  ;;  %v406_v19 = vmul.f32 %v1006_v49, %v1006_v49 }
  0xa5   : > { %v803_v20 = vadd.f32 -0.13793103, %v1000_v45  ;;  %v804_v21 = vadd.f32 -0.13793103, %v1002_v46  ;;  %v342_v22 = vadd.f32 %v337_v61, %v327_v62  ;;  %v407_v23 = vmul.f32 %v403_v10, %v1000_v45 }
  0xa6   : > { %v805_v24 = vadd.f32 -0.13793103, %v1004_v47  ;;  %v362_v25 = vmul.f32 0.005, %v339_v1  ;;  %v363_v26 = vmul.f32 0.005, %v340_v2  ;;  %v408_v27 = vmul.f32 %v404_v13, %v1002_v46 }
  0xa7   : > { %v409_v28 = vmul.f32 %v405_v14, %v1004_v47  ;;  %v806_v29 = vadd.f32 -0.13793103, %v1006_v49  ;;  %v364_v30 = vmul.f32 0.005, %v341_v7  ;;  %v365_v31 = vmul.f32 0.005, %v342_v22 }
  0xa8   : > { %v366_v32 = vsub.f32 %v1000_v45, %v362_v25  ;;  %v367_v33 = vsub.f32 %v1002_v46, %v363_v26  ;;  %v391_v34 = vsel %vm370_vm0, %v378_v8, %v387_v12  ;;  %vm399_vm4 = vcmp.gt.f32.partialorder %v1000_v45, 0.2068966 }
  0xa9   : > { %v368_v35 = vsub.f32 %v1004_v47, %v364_v30  ;;  %v392_v36 = vsel %vm371_vm1, %v379_v9, %v388_v16  ;;  %v393_v37 = vsel %vm372_vm2, %v380_v11, %v389_v17  ;;  %v394_v38 = vsel %vm373_vm3, %v381_v15, %v390_v18 }
  0xaa   : > { %vm400_vm5 = vcmp.gt.f32.partialorder %v1002_v46, 0.2068966  ;;  %vm401_vm6 = vcmp.gt.f32.partialorder %v1004_v47, 0.2068966  ;;  %v415_v39 = vmul.f32 0.12841916, %v803_v20  ;;  %v369_v42 = vsub.f32 %v1006_v49, %v365_v31 }
  0xab   : > { %v416_v40 = vmul.f32 0.12841916, %v804_v21  ;;  %v417_v41 = vmul.f32 0.12841916, %v805_v24  ;;  %vm402_vm7 = vcmp.gt.f32.partialorder %v1006_v49, 0.2068966  ;;  %v427_v50 = vmul.f32 %v366_v32, %v366_v32 }
  0xac   : > { %v418_v43 = vmul.f32 0.12841916, %v806_v29  ;;  %v1041_v44 = vmul.f32 0.95047, %v391_v34  ;;  %v1043_v48 = vmul.f32 0.95047, %v392_v36  ;;  %v428_v53 = vmul.f32 %v367_v33, %v367_v33 }
  0xad   : > { %v1045_v51 = vmul.f32 0.95047, %v393_v37  ;;  %v1047_v52 = vmul.f32 0.95047, %v394_v38  ;;  %v429_v54 = vmul.f32 %v368_v35, %v368_v35  ;;  %v430_v55 = vmul.f32 %v369_v42, %v369_v42 }
  0xae   : > { %v431_v56 = vmul.f32 %v427_v50, %v366_v32  ;;  %v807_v57 = vadd.f32 -0.13793103, %v366_v32  ;;  %v808_v58 = vadd.f32 -0.13793103, %v367_v33  ;;  %v432_v59 = vmul.f32 %v428_v53, %v367_v33 }
  0xaf   : > { %v433_v60 = vmul.f32 %v429_v54, %v368_v35  ;;  %v809_v61 = vadd.f32 -0.13793103, %v368_v35  ;;  %v810_v62 = vadd.f32 -0.13793103, %v369_v42  ;;  %vm423_vm8 = vcmp.gt.f32.partialorder %v366_v32, 0.2068966 }
  0xb0   : > { %v434_v63 = vmul.f32 %v430_v55, %v369_v42  ;;  %v439_v0 = vmul.f32 0.12841916, %v807_v57  ;;  %v440_v1 = vmul.f32 0.12841916, %v808_v58  ;;  %v410_v2 = vmul.f32 %v406_v19, %v1006_v49 }
  0xb1   : > { %vm424_vm9 = vcmp.gt.f32.partialorder %v367_v33, 0.2068966  ;;  %v441_v3 = vmul.f32 0.12841916, %v809_v61  ;;  %v442_v4 = vmul.f32 0.12841916, %v810_v62  ;;  %v419_v7 = vsel %vm399_vm4, %v407_v23, %v415_v39 }
  0xb2   : > { %vm425_vm10 = vcmp.gt.f32.partialorder %v368_v35, 0.2068966  ;;  %vm426_vm11 = vcmp.gt.f32.partialorder %v369_v42, 0.2068966  ;;  %v443_v5 = vsel %vm423_vm8, %v431_v56, %v439_v0  ;;  %v444_v6 = vsel %vm424_vm9, %v432_v59, %v440_v1 }
  0xb3   : > { %v445_v8 = vsel %vm425_vm10, %v433_v60, %v441_v3  ;;  %v446_v9 = vsel %vm426_vm11, %v434_v63, %v442_v4  ;;  %v447_v10 = vmul.f32 1.08883, %v443_v5  ;;  %v420_v11 = vsel %vm400_vm5, %v408_v27, %v416_v40 }
  0xb4   : > { %v421_v12 = vsel %vm401_vm6, %v409_v28, %v417_v41  ;;  %v448_v13 = vmul.f32 1.08883, %v444_v6  ;;  %v451_v14 = vmul.f32 3.2404814, %v1041_v44  ;;  %v422_v15 = vsel %vm402_vm7, %v410_v2, %v418_v43 }
  0xb5   : > { %v449_v16 = vmul.f32 1.08883, %v445_v8  ;;  %v450_v17 = vmul.f32 1.08883, %v446_v9  ;;  %v452_v45 = vmul.f32 3.2404814, %v1043_v48 }
  0xb6   : > { %v453_v18 = vmul.f32 3.2404814, %v1045_v51  ;;  %v454_v19 = vmul.f32 3.2404814, %v1047_v52  ;;  %v455_v20 = vmul.f32 1.5371516, %v419_v7 }
  0xb7   : > { %v456_v46 = vmul.f32 1.5371516, %v420_v11  ;;  %v463_v21 = vmul.f32 0.49853632, %v447_v10  ;;  %v457_v22 = vmul.f32 1.5371516, %v421_v12 }
  0xb8   : > { %v458_v47 = vmul.f32 1.5371516, %v422_v15  ;;  %v464_v23 = vmul.f32 0.49853632, %v448_v13  ;;  %v459_v24 = vsub.f32 %v451_v14, %v455_v20  ;;  %v465_v26 = vmul.f32 0.49853632, %v449_v16 }
  0xb9   : > { %v460_v25 = vsub.f32 %v452_v45, %v456_v46  ;;  %v466_v27 = vmul.f32 0.49853632, %v450_v17  ;;  %v461_v49 = vsub.f32 %v453_v18, %v457_v22  ;;  %v471_v28 = vmul.f32 -0.969255, %v1041_v44 }
  0xba   : > { %v472_v29 = vmul.f32 -0.969255, %v1043_v48  ;;  %v473_v30 = vmul.f32 -0.969255, %v1045_v51  ;;  %v462_v31 = vsub.f32 %v454_v19, %v458_v47  ;;  %v1065_v32 = vsub.f32 %v459_v24, %v463_v21 }
  0xbb   : > { %v474_v33 = vmul.f32 -0.969255, %v1047_v52  ;;  %v475_v34 = vmul.f32 1.87599, %v419_v7  ;;  %v1068_v35 = vsub.f32 %v460_v25, %v464_v23  ;;  %v476_v36 = vmul.f32 1.87599, %v420_v11 }
  0xbc   : > { %v477_v37 = vmul.f32 1.87599, %v421_v12  ;;  %v483_v38 = vmul.f32 0.041555926, %v447_v10  ;;  %v1070_v39 = vsub.f32 %v461_v49, %v465_v26  ;;  %v1072_v40 = vsub.f32 %v462_v31, %v466_v27 }
  0xbd   : > { %v478_v41 = vmul.f32 1.87599, %v422_v15  ;;  %v484_v42 = vmul.f32 0.041555926, %v448_v13  ;;  %v479_v43 = vadd.f32 %v475_v34, %v471_v28  ;;  %v480_v50 = vadd.f32 %v476_v36, %v472_v29 }
  0xbe   : > { %v481_v53 = vadd.f32 %v477_v37, %v473_v30  ;;  %v485_v54 = vmul.f32 0.041555926, %v449_v16  ;;  %v486_v56 = vmul.f32 0.041555926, %v450_v17  ;;  %v491_v57 = vmul.f32 0.05564664, %v1041_v44 }
  0xbf   : > { %v482_v55 = vadd.f32 %v478_v41, %v474_v33  ;;  %v492_v58 = vmul.f32 0.05564664, %v1043_v48  ;;  %v1076_v59 = vadd.f32 %v483_v38, %v479_v43  ;;  %v493_v60 = vmul.f32 0.05564664, %v1045_v51 }
  0xc0   : > { %v494_v61 = vmul.f32 0.05564664, %v1047_v52  ;;  %v495_v62 = vmul.f32 0.20404133, %v419_v7  ;;  %v1080_v63 = vadd.f32 %v484_v42, %v480_v50  ;;  %v496_v0 = vmul.f32 0.20404133, %v420_v11 }
  0xc1   : > { %v497_v1 = vmul.f32 0.20404133, %v421_v12  ;;  %v498_v2 = vmul.f32 0.20404133, %v422_v15  ;;  %v1082_v3 = vadd.f32 %v485_v54, %v481_v53  ;;  %v503_v4 = vmul.f32 1.057311, %v447_v10 }
  0xc2   : > { %v504_v5 = vmul.f32 1.057311, %v448_v13  ;;  %v511_v44 = vmax.f32 %v1065_v32, 0.0031308  ;;  %v1085_v6 = vadd.f32 %v486_v56, %v482_v55  ;;  %v505_v48 = vmul.f32 1.057311, %v449_v16 }
  0xc3   : > { %v512_v8 = vmax.f32 %v1068_v35, 0.0031308  ;;  %v513_v51 = vmax.f32 %v1070_v39, 0.0031308  ;;  %v499_v52 = vsub.f32 %v491_v57, %v495_v62  ;;  %v506_v7 = vmul.f32 1.057311, %v450_v17 }
  0xc4   : > { %v514_v9 = vmax.f32 %v1072_v40, 0.0031308  ;;  %862 = vlog2.f32 %v511_v44  ;;  %v500_v11 = vsub.f32 %v492_v58, %v496_v0  ;;  %v501_v12 = vsub.f32 %v493_v60, %v497_v1 }
  0xc5   : > { %864 = vlog2.f32 %v512_v8  ;;  %v502_v14 = vsub.f32 %v494_v61, %v498_v2  ;;  %v1090_v10 = vadd.f32 %v503_v4, %v499_v52  ;;  %v556_v16 = vmax.f32 %v1076_v59, 0.0031308 }
  0xc6   : > { %866 = vlog2.f32 %v513_v51  ;;  %v1092_v13 = vadd.f32 %v504_v5, %v500_v11  ;;  %v1094_v15 = vadd.f32 %v505_v48, %v501_v12  ;;  %v557_v17 = vmax.f32 %v1080_v63, 0.0031308 }
  0xc7   : > { %868 = vlog2.f32 %v514_v9  ;;  %v1097_v45 = vadd.f32 %v506_v7, %v502_v14  ;;  %v558_v18 = vmax.f32 %v1082_v3, 0.0031308  ;;  %v559_v19 = vmax.f32 %v1085_v6, 0.0031308 }
  0xc8   : > { %870 = vlog2.f32 %v556_v16  ;;  %v600_v20 = vmax.f32 %v1090_v10, 0.0031308  ;;  %v601_v46 = vmax.f32 %v1092_v13, 0.0031308  ;;  %v602_v21 = vmax.f32 %v1094_v15, 0.0031308 }
  0xc9   : > { %872 = vlog2.f32 %v557_v17  ;;  %v603_v22 = vmax.f32 %v1097_v45, 0.0031308  ;;  %vm544_vm12 = vcmp.gt.f32.partialorder %v1065_v32, 0.0031308  ;;  %vm545_vm13 = vcmp.gt.f32.partialorder %v1068_v35, 0.0031308 }
  0xca   : > { %874 = vlog2.f32 %v558_v18  ;;  %vm546_vm14 = vcmp.gt.f32.partialorder %v1070_v39, 0.0031308  ;;  %vm547_vm15 = vcmp.gt.f32.partialorder %v1072_v40, 0.0031308  ;;  %vm588_vm0 = vcmp.gt.f32.partialorder %v1076_v59, 0.0031308 }
  0xcb   : > { %876 = vlog2.f32 %v559_v19  ;;  %vm589_vm1 = vcmp.gt.f32.partialorder %v1080_v63, 0.0031308  ;;  %vm590_vm2 = vcmp.gt.f32.partialorder %v1082_v3, 0.0031308  ;;  %vm591_vm3 = vcmp.gt.f32.partialorder %v1085_v6, 0.0031308 }
  0xcc   : > { %878 = vlog2.f32 %v600_v20  ;;  %vm632_vm4 = vcmp.gt.f32.partialorder %v1090_v10, 0.0031308  ;;  %vm633_vm5 = vcmp.gt.f32.partialorder %v1092_v13, 0.0031308  ;;  %vm634_vm6 = vcmp.gt.f32.partialorder %v1094_v15, 0.0031308 }
  0xcd   : > { %880 = vlog2.f32 %v601_v46  ;;  %vm635_vm7 = vcmp.gt.f32.partialorder %v1097_v45, 0.0031308 }
  0xce   : > { %v863_v47 = vpop.eup %862  ;;  %882 = vlog2.f32 %v602_v21 }
  0xcf   : > { %v865_v23 = vpop.eup %864  ;;  %v516_v24 = vmul.f32 0.6931472, %v863_v47  ;;  %884 = vlog2.f32 %v603_v22 }
  0xd0   : > { %v867_v25 = vpop.eup %866  ;;  %v518_v26 = vmul.f32 0.6931472, %v865_v23  ;;  %v548_v23 = vmul.f32 12.92, %v1065_v32 }
  0xd1   : > { %v869_v27 = vpop.eup %868  ;;  %v520_v49 = vmul.f32 0.6931472, %v867_v25  ;;  %v524_v28 = vmul.f32 0.41666666, %v516_v24  ;;  %v549_v24 = vmul.f32 12.92, %v1068_v35 }
  0xd2   : > { %v522_v29 = vmul.f32 0.6931472, %v869_v27  ;;  %v525_v30 = vmul.f32 0.41666666, %v518_v26  ;;  %v871_v31 = vpop.eup %870 }
  0xd3   : > { %v526_v33 = vmul.f32 0.41666666, %v520_v49  ;;  %v528_v34 = vmul.f32 1.442695, %v524_v28  ;;  %v873_v36 = vpop.eup %872  ;;  %v561_v41 = vmul.f32 0.6931472, %v871_v31 }
  0xd4   : > { %v527_v37 = vmul.f32 0.41666666, %v522_v29  ;;  %v530_v38 = vmul.f32 1.442695, %v525_v30  ;;  %v875_v42 = vpop.eup %874  ;;  %v563_v50 = vmul.f32 0.6931472, %v873_v36 }
  0xd5   : > { %886 = vpow2.f32 %v528_v34  ;;  %v532_v43 = vmul.f32 1.442695, %v526_v33  ;;  %v877_v53 = vpop.eup %876  ;;  %v565_v55 = vmul.f32 0.6931472, %v875_v42  ;;  %v568_v56 = vmul.f32 0.41666666, %v561_v41 }
  0xd6   : > { %888 = vpow2.f32 %v530_v38  ;;  %v534_v54 = vmul.f32 1.442695, %v527_v37  ;;  %v879_v57 = vpop.eup %878  ;;  %v567_v58 = vmul.f32 0.6931472, %v877_v53  ;;  %v569_v60 = vmul.f32 0.41666666, %v563_v50 }
  0xd7   : > { %890 = vpow2.f32 %v532_v43  ;;  %v881_v61 = vpop.eup %880  ;;  %v570_v62 = vmul.f32 0.41666666, %v565_v55  ;;  %v572_v0 = vmul.f32 1.442695, %v568_v56  ;;  %v605_v1 = vmul.f32 0.6931472, %v879_v57 }
  0xd8   : > { %892 = vpow2.f32 %v534_v54  ;;  %v883_v2 = vpop.eup %882  ;;  %v571_v4 = vmul.f32 0.41666666, %v567_v58  ;;  %v574_v5 = vmul.f32 1.442695, %v569_v60  ;;  %v607_v44 = vmul.f32 0.6931472, %v881_v61 }
  0xd9   : > { %v885_v48 = vpop.eup %884  ;;  %894 = vpow2.f32 %v572_v0  ;;  %v576_v8 = vmul.f32 1.442695, %v570_v62  ;;  %v609_v51 = vmul.f32 0.6931472, %v883_v2  ;;  %v612_v52 = vmul.f32 0.41666666, %v605_v1 }
  0xda   : > { %896 = vpow2.f32 %v574_v5  ;;  %v578_v7 = vmul.f32 1.442695, %v571_v4  ;;  %v611_v9 = vmul.f32 0.6931472, %v885_v48  ;;  %v613_v11 = vmul.f32 0.41666666, %v607_v44 }
  0xdb   : > { %898 = vpow2.f32 %v576_v8  ;;  %v614_v12 = vmul.f32 0.41666666, %v609_v51  ;;  %v616_v14 = vmul.f32 1.442695, %v612_v52  ;;  %v550_v49 = vmul.f32 12.92, %v1070_v39 }
  0xdc   : > { %900 = vpow2.f32 %v578_v7  ;;  %v615_v16 = vmul.f32 0.41666666, %v611_v9  ;;  %v618_v17 = vmul.f32 1.442695, %v613_v11  ;;  %v551_v30 = vmul.f32 12.92, %v1072_v40 }
  0xdd   : > { %902 = vpow2.f32 %v616_v14  ;;  %v620_v18 = vmul.f32 1.442695, %v614_v12  ;;  %v592_v50 = vmul.f32 12.92, %v1076_v59  ;;  %v593_v56 = vmul.f32 12.92, %v1080_v63 }
  0xde   : > { %904 = vpow2.f32 %v618_v17  ;;  %v622_v20 = vmul.f32 1.442695, %v615_v16  ;;  %v594_v60 = vmul.f32 12.92, %v1082_v3  ;;  %v595_v0 = vmul.f32 12.92, %v1085_v6 }
  0xdf   : > { %v887_v19 = vpop.eup %886  ;;  %906 = vpow2.f32 %v620_v18  ;;  %v636_v59 = vmul.f32 12.92, %v1090_v10  ;;  %v637_v11 = vmul.f32 12.92, %v1092_v13  ;;  %v638_v3 = vmul.f32 12.92, %v1094_v15 }
  0xe0   : > { %v889_v46 = vpop.eup %888  ;;  %v536_v21 = vmul.f32 1.055, %v887_v19  ;;  %908 = vpow2.f32 %v622_v20  ;;  %v639_v6 = vmul.f32 12.92, %v1097_v45 }
  0xe1   : > { %v891_v22 = vpop.eup %890  ;;  %v537_v47 = vmul.f32 1.055, %v889_v46 }
  0xe2   : > { %v893_v25 = vpop.eup %892  ;;  %v538_v26 = vmul.f32 1.055, %v891_v22  ;;  %v811_v27 = vadd.f32 -0.055, %v536_v21 }
  0xe3   : > { %v539_v28 = vmul.f32 1.055, %v893_v25  ;;  %v812_v29 = vadd.f32 -0.055, %v537_v47  ;;  %v895_v31 = vpop.eup %894 }
  0xe4   : > { %v813_v33 = vadd.f32 -0.055, %v538_v26  ;;  %v552_v34 = vsel %vm544_vm12, %v811_v27, %v548_v23  ;;  %v897_v36 = vpop.eup %896  ;;  %v580_v41 = vmul.f32 1.055, %v895_v31 }
  0xe5   : > { %v814_v37 = vadd.f32 -0.055, %v539_v28  ;;  %v553_v38 = vsel %vm545_vm13, %v812_v29, %v549_v24  ;;  %644 = vst [vmem:[%s1117_s29] sm:$0xff] %v552_v34  ;;  %v899_v42 = vpop.eup %898  ;;  %v581_v43 = vmul.f32 1.055, %v897_v36 }
  0xe6   : > { %v554_v32 = vsel %vm546_vm14, %v813_v33, %v550_v49  ;;  %645 = vst [vmem:[%s1117_s29 + $0x8] sm:$0xff] %v553_v38  ;;  %v901_v53 = vpop.eup %900  ;;  %v582_v54 = vmul.f32 1.055, %v899_v42  ;;  %v815_v55 = vadd.f32 -0.055, %v580_v41 }
  0xe7   : > { %v555_v35 = vsel %vm547_vm15, %v814_v37, %v551_v30  ;;  %646 = vst [vmem:[%s1117_s29 + $0x10] sm:$0xff] %v554_v32  ;;  %v903_v57 = vpop.eup %902  ;;  %v583_v39 = vmul.f32 1.055, %v901_v53  ;;  %v816_v58 = vadd.f32 -0.055, %v581_v43 }
  0xe8   : > { %647 = vst [vmem:[%s1117_s29 + $0x18] sm:$0xff] %v555_v35  ;;  %v905_v61 = vpop.eup %904  ;;  %v817_v62 = vadd.f32 -0.055, %v582_v54  ;;  %v596_v40 = vsel %vm588_vm0, %v815_v55, %v592_v50  ;;  %v624_v1 = vmul.f32 1.055, %v903_v57 }
  0xe9   : > { %v907_v2 = vpop.eup %906  ;;  %v818_v4 = vadd.f32 -0.055, %v583_v39  ;;  %v597_v5 = vsel %vm589_vm1, %v816_v58, %v593_v56  ;;  %v625_v44 = vmul.f32 1.055, %v905_v61  ;;  %823 = vst [vmem:[%s1117_s29 + $0x20] sm:$0xff] %v596_v40 }
  0xea   : > { %v909_v48 = vpop.eup %908  ;;  %v598_v8 = vsel %vm590_vm2, %v817_v62, %v594_v60  ;;  %v626_v51 = vmul.f32 1.055, %v907_v2  ;;  %v819_v52 = vadd.f32 -0.055, %v624_v1  ;;  %824 = vst [vmem:[%s1117_s29 + $0x28] sm:$0xff] %v597_v5 }
  0xeb   : > { %v599_v7 = vsel %vm591_vm3, %v818_v4, %v595_v0  ;;  %v627_v63 = vmul.f32 1.055, %v909_v48  ;;  %v820_v9 = vadd.f32 -0.055, %v625_v44  ;;  %825 = vst [vmem:[%s1117_s29 + $0x30] sm:$0xff] %v598_v8 }
  0xec   : > { %v821_v12 = vadd.f32 -0.055, %v626_v51  ;;  %v640_v14 = vsel %vm632_vm4, %v819_v52, %v636_v59  ;;  %826 = vst [vmem:[%s1117_s29 + $0x38] sm:$0xff] %v599_v7 }
  0xed   : > { %v822_v16 = vadd.f32 -0.055, %v627_v63  ;;  %v641_v17 = vsel %vm633_vm5, %v820_v9, %v637_v11  ;;  %827 = vst [vmem:[%s1117_s29 + $0x40] sm:$0xff] %v640_v14 }
  0xee   : > { %v642_v18 = vsel %vm634_vm6, %v821_v12, %v638_v3  ;;  %828 = vst [vmem:[%s1117_s29 + $0x48] sm:$0xff] %v641_v17 }
  0xef   : > { %v643_v19 = vsel %vm635_vm7, %v822_v16, %v639_v6  ;;  %829 = vst [vmem:[%s1117_s29 + $0x50] sm:$0xff] %v642_v18 }
  0xf0   : > { %830 = vst [vmem:[%s1117_s29 + $0x58] sm:$0xff] %v643_v19 }
  0xf1 PF: > { %s13_s14 = sadd.s32 1, %s932_s14   ;;  %s1180_s12 = smov %s928_s13 }
  0xf2   : > { %p10_p5 = scmp.ge.s32.totalorder %s13_s14, 4   ;;  %s1181_s13 = smov %s1183_s15 }
  0xf4   :  { %12 = sbr.rel (!%p10_p5) target bundleno = 2 (0x2), region = 76 }

</bundles_post_ra>
